<compile_context>
chip_gen: v7x
topology: tpu7x:2x2x1
jax: 0.10.0
libtpu: 0.0.40
codegen_flags: <defaults>
</compile_context>

<pallas_src>
import functools

import jax
import jax.numpy as jnp
from jax import lax
from jax.experimental import pallas as pl
from jax.experimental.pallas import tpu as pltpu


BERT_LN_EPS = 1e-12   # BERT LayerNorm eps
HEAD_LN_EPS = 1e-5    # nn.LayerNorm default eps


# -----------------------------------------------------------------------------
# Fused Pallas kernel: whole encoder + head for one batch element per grid step
# -----------------------------------------------------------------------------

def _layer_norm(y, g, b, eps):
    mu = jnp.mean(y, axis=-1, keepdims=True)
    var = jnp.mean(jnp.square(y - mu), axis=-1, keepdims=True)
    return (y - mu) * lax.rsqrt(var + eps) * g + b


def fused_encoder_kernel(word_ref, pos_ref, mask_ref,
                         emb_g_ref, emb_b_ref,
                         wqkv_ref, bqkv_ref, wo_ref, bo_ref,
                         ln1_g_ref, ln1_b_ref,
                         w1_ref, b1_ref, w2_ref, b2_ref,
                         ln2_g_ref, ln2_b_ref,
                         head_w_ref, head_b_ref, head_g_ref, head_bt_ref,
                         o_ref, *,
                         num_layers, num_heads, head_dim, scale,
                         bert_eps, head_eps):
    """One batch element: embeddings LN -> L transformer layers -> CLS head LN."""
    H = word_ref.shape[-1]

    # --- embeddings: word + position, LayerNorm (no residual, no zeros tensor) ---
    x = word_ref[...] + pos_ref[...]                                 # (S, H)
    x = _layer_norm(x, emb_g_ref[...], emb_b_ref[...], bert_eps)

    bias = mask_ref[...]                                             # (1, S) additive key mask

    # --- transformer layers (static unrolled loop; weights stacked over layers) ---
    for l in range(num_layers):
        # fused QKV projection: one (S,H) @ (H,3H) matmul
        qkv = jnp.dot(x, wqkv_ref[l], preferred_element_type=jnp.float32) + bqkv_ref[l]

        # per-head attention on contiguous column slices of the QKV slab
        ctx_heads = []
        for h in range(num_heads):
            q = qkv[:, h * head_dim:(h + 1) * head_dim]              # (S, dh)
            k = qkv[:, H + h * head_dim: H + (h + 1) * head_dim]     # (S, dh)
            v = qkv[:, 2 * H + h * head_dim: 2 * H + (h + 1) * head_dim]
            s = jnp.dot(q, k.T, preferred_element_type=jnp.float32) * scale
            s = s + bias                                             # mask keys
            m = jnp.max(s, axis=-1, keepdims=True)
            p = jnp.exp(s - m)
            p = p * pl.reciprocal(jnp.sum(p, axis=-1, keepdims=True), approx=True)
            ctx_heads.append(jnp.dot(p, v, preferred_element_type=jnp.float32))
        ctx = jnp.concatenate(ctx_heads, axis=-1)                    # (S, H) lane-dense

        # output projection + residual + LayerNorm (fused epilogue)
        attn_out = jnp.dot(ctx, wo_ref[l], preferred_element_type=jnp.float32) + bo_ref[l]
        x = _layer_norm(attn_out + x, ln1_g_ref[l], ln1_b_ref[l], bert_eps)

        # feed-forward + residual + LayerNorm (fused epilogue)
        # TODO(synk): HF BERT uses exact erf GELU; tanh approximation used here.
        h1 = jnp.dot(x, w1_ref[l], preferred_element_type=jnp.float32) + b1_ref[l]
        h1 = jax.nn.gelu(h1, approximate=True)
        ffn = jnp.dot(h1, w2_ref[l], preferred_element_type=jnp.float32) + b2_ref[l]
        x = _layer_norm(ffn + x, ln2_g_ref[l], ln2_b_ref[l], bert_eps)

    # --- TextEncoder head: CLS row -> Linear -> LayerNorm ---
    cls = x[0:1, :]                                                  # (1, H) CLS token row
    y = jnp.dot(cls, head_w_ref[...], preferred_element_type=jnp.float32) + head_b_ref[...]
    o_ref[...] = _layer_norm(y, head_g_ref[...], head_bt_ref[...], head_eps)


# -----------------------------------------------------------------------------
# Wrapper: single pallas_call for the full forward pass
# -----------------------------------------------------------------------------

def _full_spec(a):
    """Whole-array VMEM block, constant across the batch grid."""
    zeros = (0,) * a.ndim
    return pl.BlockSpec(a.shape, lambda b, _z=zeros: _z)


def text_encoder_forward(params, input_ids, attention_mask, cfg):
    B, S = input_ids.shape
    H, nH, dh = cfg["hidden"], cfg["heads"], cfg["head_dim"]
    L, NOUT = cfg["layers"], cfg["nout"]

    # TODO(synk): embedding gather stays in plain JAX (data-dependent gather).
    word = jnp.take(params["word_emb"], input_ids, axis=0)           # (B, S, H)
    pos = params["pos_emb"][:S]                                      # (S, H)
    mask_bias = ((1.0 - attention_mask.astype(jnp.float32)) * -1e9).reshape(B, 1, S)

    kern = functools.partial(
        fused_encoder_kernel,
        num_layers=L, num_heads=nH, head_dim=dh,
        scale=1.0 / float(dh) ** 0.5,
        bert_eps=BERT_LN_EPS, head_eps=HEAD_LN_EPS)

    args = (word, pos, mask_bias,
            params["emb_ln_g"], params["emb_ln_b"],
            params["wqkv"], params["bqkv"], params["wo"], params["bo"],
            params["ln1_g"], params["ln1_b"],
            params["w1"], params["b1"], params["w2"], params["b2"],
            params["ln2_g"], params["ln2_b"],
            params["head_w"], params["head_b"],
            params["head_ln_g"], params["head_ln_b"])

    in_specs = [
        pl.BlockSpec((None, S, H), lambda b: (b, 0, 0)),   # word embeddings (per batch)
        pl.BlockSpec((S, H), lambda b: (0, 0)),            # position embeddings
        pl.BlockSpec((None, 1, S), lambda b: (b, 0, 0)),   # additive key mask (per batch)
    ] + [_full_spec(a) for a in args[3:]]                  # all weights: full-array blocks

    out = pl.pallas_call(
        kern,
        grid=(B,),
        in_specs=in_specs,
        out_specs=pl.BlockSpec((None, 1, NOUT), lambda b: (b, 0, 0)),
        out_shape=jax.ShapeDtypeStruct((B, 1, NOUT), jnp.float32),
        compiler_params=pltpu.CompilerParams(
            dimension_semantics=("parallel",)),            # v7x: shard batches over 2 TCs
    )(*args)

    return out.reshape(B, NOUT)


# -----------------------------------------------------------------------------
# Deterministic parameter initialization (synthetic mini-BERT + head)
# -----------------------------------------------------------------------------

def init_params(key, cfg):
    H, FFN, NOUT = cfg["hidden"], cfg["ffn"], cfg["nout"]
    VOCAB, SMAX, L = cfg["vocab"], cfg["max_seq"], cfg["layers"]

    def nrm(k, shape, std=0.02):
        return (std * jax.random.normal(k, shape)).astype(jnp.float32)

    ks = iter(jax.random.split(key, 16))
    return {
        "word_emb": nrm(next(ks), (VOCAB, H)),
        "pos_emb": nrm(next(ks), (SMAX, H)),
        "emb_ln_g": jnp.ones((1, H), jnp.float32),
        "emb_ln_b": jnp.zeros((1, H), jnp.float32),
        # per-layer weights stacked over the layer dim; QKV fused into one (H, 3H) weight
        "wqkv": nrm(next(ks), (L, H, 3 * H)),
        "bqkv": nrm(next(ks), (L, 1, 3 * H)),
        "wo": nrm(next(ks), (L, H, H)),
        "bo": nrm(next(ks), (L, 1, H)),
        "ln1_g": jnp.ones((L, 1, H), jnp.float32),
        "ln1_b": jnp.zeros((L, 1, H), jnp.float32),
        "w1": nrm(next(ks), (L, H, FFN)),
        "b1": nrm(next(ks), (L, 1, FFN)),
        "w2": nrm(next(ks), (L, FFN, H)),
        "b2": nrm(next(ks), (L, 1, H)),
        "ln2_g": jnp.ones((L, 1, H), jnp.float32),
        "ln2_b": jnp.zeros((L, 1, H), jnp.float32),
        "head_w": nrm(next(ks), (H, NOUT)),
        "head_b": nrm(next(ks), (1, NOUT)),
        "head_ln_g": jnp.ones((1, NOUT), jnp.float32),
        "head_ln_b": jnp.zeros((1, NOUT), jnp.float32),
    }


# -----------------------------------------------------------------------------
# Main
# -----------------------------------------------------------------------------

if __name__ == "__main__":
    cfg = dict(vocab=64, hidden=32, heads=4, head_dim=8, ffn=64,
               nout=32, layers=2, max_seq=16)

    key = jax.random.PRNGKey(0)
    k_param, k_ids = jax.random.split(key)

    B, S = 2, 8
    params = init_params(k_param, cfg)
    input_ids = jax.random.randint(k_ids, (B, S), 0, cfg["vocab"], dtype=jnp.int32)
    attention_mask = jnp.ones((B, S), jnp.float32).at[1, 6:].set(0.0)  # pad last 2 of row 1

    fwd = jax.jit(functools.partial(text_encoder_forward, cfg=cfg))
    out = fwd(params, input_ids, attention_mask)
    jax.block_until_ready(out)

    assert out.shape == (B, cfg["nout"]) and out.dtype == jnp.float32
    assert bool(jnp.all(jnp.isfinite(out)))
    print("KERNEL_OK")
</pallas_src>

<mosaic_0001>
module attributes {stable_mosaic.version = 11 : i64} {
  func.func @fused_encoder_kernel(%arg0: i32, %arg1: memref<1x8x32xf32, #tpu.memory_space<vmem>>, %arg2: memref<8x32xf32, #tpu.memory_space<vmem>>, %arg3: memref<1x1x8xf32, #tpu.memory_space<vmem>>, %arg4: memref<1x32xf32, #tpu.memory_space<vmem>>, %arg5: memref<1x32xf32, #tpu.memory_space<vmem>>, %arg6: memref<2x32x96xf32, #tpu.memory_space<vmem>>, %arg7: memref<2x1x96xf32, #tpu.memory_space<vmem>>, %arg8: memref<2x32x32xf32, #tpu.memory_space<vmem>>, %arg9: memref<2x1x32xf32, #tpu.memory_space<vmem>>, %arg10: memref<2x1x32xf32, #tpu.memory_space<vmem>>, %arg11: memref<2x1x32xf32, #tpu.memory_space<vmem>>, %arg12: memref<2x32x64xf32, #tpu.memory_space<vmem>>, %arg13: memref<2x1x64xf32, #tpu.memory_space<vmem>>, %arg14: memref<2x64x32xf32, #tpu.memory_space<vmem>>, %arg15: memref<2x1x32xf32, #tpu.memory_space<vmem>>, %arg16: memref<2x1x32xf32, #tpu.memory_space<vmem>>, %arg17: memref<2x1x32xf32, #tpu.memory_space<vmem>>, %arg18: memref<32x32xf32, #tpu.memory_space<vmem>>, %arg19: memref<1x32xf32, #tpu.memory_space<vmem>>, %arg20: memref<1x32xf32, #tpu.memory_space<vmem>>, %arg21: memref<1x32xf32, #tpu.memory_space<vmem>>, %arg22: memref<1x1x32xf32, #tpu.memory_space<vmem>>) attributes {dimension_semantics = [#tpu.dimension_semantics<parallel>], iteration_bounds = array<i64: 2>, scalar_prefetch = 0 : i64, scratch_operands = 0 : i64, tpu.core_type = #tpu.core_type<tc>, window_params = [{transform_indices = @transform_0, window_bounds = array<i64: 1, 8, 32>}, {pipeline_mode = #tpu.pipeline_mode<synchronous>, transform_indices = @transform_1, window_bounds = array<i64: 8, 32>}, {transform_indices = @transform_2, window_bounds = array<i64: 1, 1, 8>}, {pipeline_mode = #tpu.pipeline_mode<synchronous>, transform_indices = @transform_3, window_bounds = array<i64: 1, 32>}, {pipeline_mode = #tpu.pipeline_mode<synchronous>, transform_indices = @transform_4, window_bounds = array<i64: 1, 32>}, {pipeline_mode = #tpu.pipeline_mode<synchronous>, transform_indices = @transform_5, window_bounds = array<i64: 2, 32, 96>}, {pipeline_mode = #tpu.pipeline_mode<synchronous>, transform_indices = @transform_6, window_bounds = array<i64: 2, 1, 96>}, {pipeline_mode = #tpu.pipeline_mode<synchronous>, transform_indices = @transform_7, window_bounds = array<i64: 2, 32, 32>}, {pipeline_mode = #tpu.pipeline_mode<synchronous>, transform_indices = @transform_8, window_bounds = array<i64: 2, 1, 32>}, {pipeline_mode = #tpu.pipeline_mode<synchronous>, transform_indices = @transform_9, window_bounds = array<i64: 2, 1, 32>}, {pipeline_mode = #tpu.pipeline_mode<synchronous>, transform_indices = @transform_10, window_bounds = array<i64: 2, 1, 32>}, {pipeline_mode = #tpu.pipeline_mode<synchronous>, transform_indices = @transform_11, window_bounds = array<i64: 2, 32, 64>}, {pipeline_mode = #tpu.pipeline_mode<synchronous>, transform_indices = @transform_12, window_bounds = array<i64: 2, 1, 64>}, {pipeline_mode = #tpu.pipeline_mode<synchronous>, transform_indices = @transform_13, window_bounds = array<i64: 2, 64, 32>}, {pipeline_mode = #tpu.pipeline_mode<synchronous>, transform_indices = @transform_14, window_bounds = array<i64: 2, 1, 32>}, {pipeline_mode = #tpu.pipeline_mode<synchronous>, transform_indices = @transform_15, window_bounds = array<i64: 2, 1, 32>}, {pipeline_mode = #tpu.pipeline_mode<synchronous>, transform_indices = @transform_16, window_bounds = array<i64: 2, 1, 32>}, {pipeline_mode = #tpu.pipeline_mode<synchronous>, transform_indices = @transform_17, window_bounds = array<i64: 32, 32>}, {pipeline_mode = #tpu.pipeline_mode<synchronous>, transform_indices = @transform_18, window_bounds = array<i64: 1, 32>}, {pipeline_mode = #tpu.pipeline_mode<synchronous>, transform_indices = @transform_19, window_bounds = array<i64: 1, 32>}, {pipeline_mode = #tpu.pipeline_mode<synchronous>, transform_indices = @transform_20, window_bounds = array<i64: 1, 32>}, {transform_indices = @transform_21, window_bounds = array<i64: 1, 1, 32>}]} {
    %c0 = arith.constant 0 : index
    %c0_0 = arith.constant 0 : index
    %c0_1 = arith.constant 0 : index
    %0 = vector.load %arg1[%c0, %c0_0, %c0_1] : memref<1x8x32xf32, #tpu.memory_space<vmem>>, vector<1x8x32xf32>
    %1 = vector.shape_cast %0 : vector<1x8x32xf32> to vector<8x32xf32>
    %c0_2 = arith.constant 0 : index
    %c0_3 = arith.constant 0 : index
    %2 = vector.load %arg2[%c0_2, %c0_3] : memref<8x32xf32, #tpu.memory_space<vmem>>, vector<8x32xf32>
    %3 = arith.addf %1, %2 : vector<8x32xf32>
    %c0_4 = arith.constant 0 : index
    %c0_5 = arith.constant 0 : index
    %4 = vector.load %arg4[%c0_4, %c0_5] : memref<1x32xf32, #tpu.memory_space<vmem>>, vector<1x32xf32>
    %c0_6 = arith.constant 0 : index
    %c0_7 = arith.constant 0 : index
    %5 = vector.load %arg5[%c0_6, %c0_7] : memref<1x32xf32, #tpu.memory_space<vmem>>, vector<1x32xf32>
    %cst = arith.constant dense<0.000000e+00> : vector<8xf32>
    %6 = vector.multi_reduction <add>, %3, %cst [1] : vector<8x32xf32> to vector<8xf32>
    %7 = vector.shape_cast %6 : vector<8xf32> to vector<8x1xf32>
    %cst_8 = arith.constant 3.200000e+01 : f32
    %8 = vector.broadcast %cst_8 : f32 to vector<8x1xf32>
    %9 = arith.divf %7, %8 : vector<8x1xf32>
    %10 = vector.broadcast %9 : vector<8x1xf32> to vector<8x32xf32>
    %11 = arith.subf %3, %10 : vector<8x32xf32>
    %12 = arith.mulf %11, %11 : vector<8x32xf32>
    %cst_9 = arith.constant dense<0.000000e+00> : vector<8xf32>
    %13 = vector.multi_reduction <add>, %12, %cst_9 [1] : vector<8x32xf32> to vector<8xf32>
    %14 = vector.shape_cast %13 : vector<8xf32> to vector<8x1xf32>
    %cst_10 = arith.constant 3.200000e+01 : f32
    %15 = vector.broadcast %cst_10 : f32 to vector<8x1xf32>
    %16 = arith.divf %14, %15 : vector<8x1xf32>
    %17 = vector.broadcast %9 : vector<8x1xf32> to vector<8x32xf32>
    %18 = arith.subf %3, %17 : vector<8x32xf32>
    %cst_11 = arith.constant 9.99999996E-13 : f32
    %19 = vector.broadcast %cst_11 : f32 to vector<8x1xf32>
    %20 = arith.addf %16, %19 : vector<8x1xf32>
    %21 = math.rsqrt %20 : vector<8x1xf32>
    %22 = vector.broadcast %21 : vector<8x1xf32> to vector<8x32xf32>
    %23 = arith.mulf %18, %22 : vector<8x32xf32>
    %24 = vector.broadcast %4 : vector<1x32xf32> to vector<8x32xf32>
    %25 = arith.mulf %23, %24 : vector<8x32xf32>
    %26 = vector.broadcast %5 : vector<1x32xf32> to vector<8x32xf32>
    %27 = arith.addf %25, %26 : vector<8x32xf32>
    %c0_12 = arith.constant 0 : index
    %c0_13 = arith.constant 0 : index
    %c0_14 = arith.constant 0 : index
    %28 = vector.load %arg3[%c0_12, %c0_13, %c0_14] : memref<1x1x8xf32, #tpu.memory_space<vmem>>, vector<1x1x8xf32>
    %29 = vector.shape_cast %28 : vector<1x1x8xf32> to vector<1x8xf32>
    %c0_15 = arith.constant 0 : index
    %c0_16 = arith.constant 0 : index
    %c0_17 = arith.constant 0 : index
    %30 = vector.load %arg6[%c0_15, %c0_16, %c0_17] : memref<2x32x96xf32, #tpu.memory_space<vmem>>, vector<1x32x96xf32>
    %31 = vector.shape_cast %30 : vector<1x32x96xf32> to vector<32x96xf32>
    %cst_18 = arith.constant dense<0.000000e+00> : vector<8x96xf32>
    %32 = tpu.matmul %27, %31, %cst_18 {dimension_numbers = #tpu.dot_dimension_numbers<[1], [0], [0], [1], [0, 0, 1, 1], [], []>} : vector<8x32xf32>, vector<32x96xf32>, vector<8x96xf32> -> vector<8x96xf32>
    %c0_19 = arith.constant 0 : index
    %c0_20 = arith.constant 0 : index
    %c0_21 = arith.constant 0 : index
    %33 = vector.load %arg7[%c0_19, %c0_20, %c0_21] : memref<2x1x96xf32, #tpu.memory_space<vmem>>, vector<1x1x96xf32>
    %34 = vector.shape_cast %33 : vector<1x1x96xf32> to vector<1x96xf32>
    %35 = vector.broadcast %34 : vector<1x96xf32> to vector<8x96xf32>
    %36 = arith.addf %32, %35 : vector<8x96xf32>
    %37 = vector.extract_strided_slice %36 {offsets = [0, 0], sizes = [8, 8], strides = [1, 1]} : vector<8x96xf32> to vector<8x8xf32>
    %38 = vector.extract_strided_slice %36 {offsets = [0, 32], sizes = [8, 8], strides = [1, 1]} : vector<8x96xf32> to vector<8x8xf32>
    %39 = vector.extract_strided_slice %36 {offsets = [0, 64], sizes = [8, 8], strides = [1, 1]} : vector<8x96xf32> to vector<8x8xf32>
    %40 = tpu.transpose %38, [1, 0] : vector<8x8xf32> -> vector<8x8xf32>
    %cst_22 = arith.constant dense<0.000000e+00> : vector<8x8xf32>
    %41 = tpu.matmul %37, %40, %cst_22 {dimension_numbers = #tpu.dot_dimension_numbers<[1], [0], [0], [1], [0, 0, 1, 1], [], []>} : vector<8x8xf32>, vector<8x8xf32>, vector<8x8xf32> -> vector<8x8xf32>
    %cst_23 = arith.constant 0.353553385 : f32
    %42 = vector.broadcast %cst_23 : f32 to vector<8x8xf32>
    %43 = arith.mulf %41, %42 : vector<8x8xf32>
    %44 = vector.broadcast %29 : vector<1x8xf32> to vector<8x8xf32>
    %45 = arith.addf %43, %44 : vector<8x8xf32>
    %cst_24 = arith.constant dense<0xFF800000> : vector<8xf32>
    %46 = vector.multi_reduction <maximumf>, %45, %cst_24 [1] : vector<8x8xf32> to vector<8xf32>
    %47 = vector.shape_cast %46 : vector<8xf32> to vector<8x1xf32>
    %48 = vector.broadcast %47 : vector<8x1xf32> to vector<8x8xf32>
    %49 = arith.subf %45, %48 : vector<8x8xf32>
    %50 = math.exp %49 : vector<8x8xf32>
    %cst_25 = arith.constant dense<0.000000e+00> : vector<8xf32>
    %51 = vector.multi_reduction <add>, %50, %cst_25 [1] : vector<8x8xf32> to vector<8xf32>
    %52 = vector.shape_cast %51 : vector<8xf32> to vector<8x1xf32>
    %53 = tpu.reciprocal %52 {approx = true} : vector<8x1xf32> -> vector<8x1xf32>
    %54 = vector.broadcast %53 : vector<8x1xf32> to vector<8x8xf32>
    %55 = arith.mulf %50, %54 : vector<8x8xf32>
    %cst_26 = arith.constant dense<0.000000e+00> : vector<8x8xf32>
    %56 = tpu.matmul %55, %39, %cst_26 {dimension_numbers = #tpu.dot_dimension_numbers<[1], [0], [0], [1], [0, 0, 1, 1], [], []>} : vector<8x8xf32>, vector<8x8xf32>, vector<8x8xf32> -> vector<8x8xf32>
    %57 = vector.extract_strided_slice %36 {offsets = [0, 8], sizes = [8, 8], strides = [1, 1]} : vector<8x96xf32> to vector<8x8xf32>
    %58 = vector.extract_strided_slice %36 {offsets = [0, 40], sizes = [8, 8], strides = [1, 1]} : vector<8x96xf32> to vector<8x8xf32>
    %59 = vector.extract_strided_slice %36 {offsets = [0, 72], sizes = [8, 8], strides = [1, 1]} : vector<8x96xf32> to vector<8x8xf32>
    %60 = tpu.transpose %58, [1, 0] : vector<8x8xf32> -> vector<8x8xf32>
    %cst_27 = arith.constant dense<0.000000e+00> : vector<8x8xf32>
    %61 = tpu.matmul %57, %60, %cst_27 {dimension_numbers = #tpu.dot_dimension_numbers<[1], [0], [0], [1], [0, 0, 1, 1], [], []>} : vector<8x8xf32>, vector<8x8xf32>, vector<8x8xf32> -> vector<8x8xf32>
    %cst_28 = arith.constant 0.353553385 : f32
    %62 = vector.broadcast %cst_28 : f32 to vector<8x8xf32>
    %63 = arith.mulf %61, %62 : vector<8x8xf32>
    %64 = vector.broadcast %29 : vector<1x8xf32> to vector<8x8xf32>
    %65 = arith.addf %63, %64 : vector<8x8xf32>
    %cst_29 = arith.constant dense<0xFF800000> : vector<8xf32>
    %66 = vector.multi_reduction <maximumf>, %65, %cst_29 [1] : vector<8x8xf32> to vector<8xf32>
    %67 = vector.shape_cast %66 : vector<8xf32> to vector<8x1xf32>
    %68 = vector.broadcast %67 : vector<8x1xf32> to vector<8x8xf32>
    %69 = arith.subf %65, %68 : vector<8x8xf32>
    %70 = math.exp %69 : vector<8x8xf32>
    %cst_30 = arith.constant dense<0.000000e+00> : vector<8xf32>
    %71 = vector.multi_reduction <add>, %70, %cst_30 [1] : vector<8x8xf32> to vector<8xf32>
    %72 = vector.shape_cast %71 : vector<8xf32> to vector<8x1xf32>
    %73 = tpu.reciprocal %72 {approx = true} : vector<8x1xf32> -> vector<8x1xf32>
    %74 = vector.broadcast %73 : vector<8x1xf32> to vector<8x8xf32>
    %75 = arith.mulf %70, %74 : vector<8x8xf32>
    %cst_31 = arith.constant dense<0.000000e+00> : vector<8x8xf32>
    %76 = tpu.matmul %75, %59, %cst_31 {dimension_numbers = #tpu.dot_dimension_numbers<[1], [0], [0], [1], [0, 0, 1, 1], [], []>} : vector<8x8xf32>, vector<8x8xf32>, vector<8x8xf32> -> vector<8x8xf32>
    %77 = vector.extract_strided_slice %36 {offsets = [0, 16], sizes = [8, 8], strides = [1, 1]} : vector<8x96xf32> to vector<8x8xf32>
    %78 = vector.extract_strided_slice %36 {offsets = [0, 48], sizes = [8, 8], strides = [1, 1]} : vector<8x96xf32> to vector<8x8xf32>
    %79 = vector.extract_strided_slice %36 {offsets = [0, 80], sizes = [8, 8], strides = [1, 1]} : vector<8x96xf32> to vector<8x8xf32>
    %80 = tpu.transpose %78, [1, 0] : vector<8x8xf32> -> vector<8x8xf32>
    %cst_32 = arith.constant dense<0.000000e+00> : vector<8x8xf32>
    %81 = tpu.matmul %77, %80, %cst_32 {dimension_numbers = #tpu.dot_dimension_numbers<[1], [0], [0], [1], [0, 0, 1, 1], [], []>} : vector<8x8xf32>, vector<8x8xf32>, vector<8x8xf32> -> vector<8x8xf32>
    %cst_33 = arith.constant 0.353553385 : f32
    %82 = vector.broadcast %cst_33 : f32 to vector<8x8xf32>
    %83 = arith.mulf %81, %82 : vector<8x8xf32>
    %84 = vector.broadcast %29 : vector<1x8xf32> to vector<8x8xf32>
    %85 = arith.addf %83, %84 : vector<8x8xf32>
    %cst_34 = arith.constant dense<0xFF800000> : vector<8xf32>
    %86 = vector.multi_reduction <maximumf>, %85, %cst_34 [1] : vector<8x8xf32> to vector<8xf32>
    %87 = vector.shape_cast %86 : vector<8xf32> to vector<8x1xf32>
    %88 = vector.broadcast %87 : vector<8x1xf32> to vector<8x8xf32>
    %89 = arith.subf %85, %88 : vector<8x8xf32>
    %90 = math.exp %89 : vector<8x8xf32>
    %cst_35 = arith.constant dense<0.000000e+00> : vector<8xf32>
    %91 = vector.multi_reduction <add>, %90, %cst_35 [1] : vector<8x8xf32> to vector<8xf32>
    %92 = vector.shape_cast %91 : vector<8xf32> to vector<8x1xf32>
    %93 = tpu.reciprocal %92 {approx = true} : vector<8x1xf32> -> vector<8x1xf32>
    %94 = vector.broadcast %93 : vector<8x1xf32> to vector<8x8xf32>
    %95 = arith.mulf %90, %94 : vector<8x8xf32>
    %cst_36 = arith.constant dense<0.000000e+00> : vector<8x8xf32>
    %96 = tpu.matmul %95, %79, %cst_36 {dimension_numbers = #tpu.dot_dimension_numbers<[1], [0], [0], [1], [0, 0, 1, 1], [], []>} : vector<8x8xf32>, vector<8x8xf32>, vector<8x8xf32> -> vector<8x8xf32>
    %97 = vector.extract_strided_slice %36 {offsets = [0, 24], sizes = [8, 8], strides = [1, 1]} : vector<8x96xf32> to vector<8x8xf32>
    %98 = vector.extract_strided_slice %36 {offsets = [0, 56], sizes = [8, 8], strides = [1, 1]} : vector<8x96xf32> to vector<8x8xf32>
    %99 = vector.extract_strided_slice %36 {offsets = [0, 88], sizes = [8, 8], strides = [1, 1]} : vector<8x96xf32> to vector<8x8xf32>
    %100 = tpu.transpose %98, [1, 0] : vector<8x8xf32> -> vector<8x8xf32>
    %cst_37 = arith.constant dense<0.000000e+00> : vector<8x8xf32>
    %101 = tpu.matmul %97, %100, %cst_37 {dimension_numbers = #tpu.dot_dimension_numbers<[1], [0], [0], [1], [0, 0, 1, 1], [], []>} : vector<8x8xf32>, vector<8x8xf32>, vector<8x8xf32> -> vector<8x8xf32>
    %cst_38 = arith.constant 0.353553385 : f32
    %102 = vector.broadcast %cst_38 : f32 to vector<8x8xf32>
    %103 = arith.mulf %101, %102 : vector<8x8xf32>
    %104 = vector.broadcast %29 : vector<1x8xf32> to vector<8x8xf32>
    %105 = arith.addf %103, %104 : vector<8x8xf32>
    %cst_39 = arith.constant dense<0xFF800000> : vector<8xf32>
    %106 = vector.multi_reduction <maximumf>, %105, %cst_39 [1] : vector<8x8xf32> to vector<8xf32>
    %107 = vector.shape_cast %106 : vector<8xf32> to vector<8x1xf32>
    %108 = vector.broadcast %107 : vector<8x1xf32> to vector<8x8xf32>
    %109 = arith.subf %105, %108 : vector<8x8xf32>
    %110 = math.exp %109 : vector<8x8xf32>
    %cst_40 = arith.constant dense<0.000000e+00> : vector<8xf32>
    %111 = vector.multi_reduction <add>, %110, %cst_40 [1] : vector<8x8xf32> to vector<8xf32>
    %112 = vector.shape_cast %111 : vector<8xf32> to vector<8x1xf32>
    %113 = tpu.reciprocal %112 {approx = true} : vector<8x1xf32> -> vector<8x1xf32>
    %114 = vector.broadcast %113 : vector<8x1xf32> to vector<8x8xf32>
    %115 = arith.mulf %110, %114 : vector<8x8xf32>
    %cst_41 = arith.constant dense<0.000000e+00> : vector<8x8xf32>
    %116 = tpu.matmul %115, %99, %cst_41 {dimension_numbers = #tpu.dot_dimension_numbers<[1], [0], [0], [1], [0, 0, 1, 1], [], []>} : vector<8x8xf32>, vector<8x8xf32>, vector<8x8xf32> -> vector<8x8xf32>
    %117 = tpu.concatenate %56, %76, %96, %116 in 1 : vector<8x8xf32>, vector<8x8xf32>, vector<8x8xf32>, vector<8x8xf32> -> vector<8x32xf32>
    %c0_42 = arith.constant 0 : index
    %c0_43 = arith.constant 0 : index
    %c0_44 = arith.constant 0 : index
    %118 = vector.load %arg8[%c0_42, %c0_43, %c0_44] : memref<2x32x32xf32, #tpu.memory_space<vmem>>, vector<1x32x32xf32>
    %119 = vector.shape_cast %118 : vector<1x32x32xf32> to vector<32x32xf32>
    %cst_45 = arith.constant dense<0.000000e+00> : vector<8x32xf32>
    %120 = tpu.matmul %117, %119, %cst_45 {dimension_numbers = #tpu.dot_dimension_numbers<[1], [0], [0], [1], [0, 0, 1, 1], [], []>} : vector<8x32xf32>, vector<32x32xf32>, vector<8x32xf32> -> vector<8x32xf32>
    %c0_46 = arith.constant 0 : index
    %c0_47 = arith.constant 0 : index
    %c0_48 = arith.constant 0 : index
    %121 = vector.load %arg9[%c0_46, %c0_47, %c0_48] : memref<2x1x32xf32, #tpu.memory_space<vmem>>, vector<1x1x32xf32>
    %122 = vector.shape_cast %121 : vector<1x1x32xf32> to vector<1x32xf32>
    %123 = vector.broadcast %122 : vector<1x32xf32> to vector<8x32xf32>
    %124 = arith.addf %120, %123 : vector<8x32xf32>
    %125 = arith.addf %124, %27 : vector<8x32xf32>
    %c0_49 = arith.constant 0 : index
    %c0_50 = arith.constant 0 : index
    %c0_51 = arith.constant 0 : index
    %126 = vector.load %arg10[%c0_49, %c0_50, %c0_51] : memref<2x1x32xf32, #tpu.memory_space<vmem>>, vector<1x1x32xf32>
    %127 = vector.shape_cast %126 : vector<1x1x32xf32> to vector<1x32xf32>
    %c0_52 = arith.constant 0 : index
    %c0_53 = arith.constant 0 : index
    %c0_54 = arith.constant 0 : index
    %128 = vector.load %arg11[%c0_52, %c0_53, %c0_54] : memref<2x1x32xf32, #tpu.memory_space<vmem>>, vector<1x1x32xf32>
    %129 = vector.shape_cast %128 : vector<1x1x32xf32> to vector<1x32xf32>
    %cst_55 = arith.constant dense<0.000000e+00> : vector<8xf32>
    %130 = vector.multi_reduction <add>, %125, %cst_55 [1] : vector<8x32xf32> to vector<8xf32>
    %131 = vector.shape_cast %130 : vector<8xf32> to vector<8x1xf32>
    %cst_56 = arith.constant 3.200000e+01 : f32
    %132 = vector.broadcast %cst_56 : f32 to vector<8x1xf32>
    %133 = arith.divf %131, %132 : vector<8x1xf32>
    %134 = vector.broadcast %133 : vector<8x1xf32> to vector<8x32xf32>
    %135 = arith.subf %125, %134 : vector<8x32xf32>
    %136 = arith.mulf %135, %135 : vector<8x32xf32>
    %cst_57 = arith.constant dense<0.000000e+00> : vector<8xf32>
    %137 = vector.multi_reduction <add>, %136, %cst_57 [1] : vector<8x32xf32> to vector<8xf32>
    %138 = vector.shape_cast %137 : vector<8xf32> to vector<8x1xf32>
    %cst_58 = arith.constant 3.200000e+01 : f32
    %139 = vector.broadcast %cst_58 : f32 to vector<8x1xf32>
    %140 = arith.divf %138, %139 : vector<8x1xf32>
    %141 = vector.broadcast %133 : vector<8x1xf32> to vector<8x32xf32>
    %142 = arith.subf %125, %141 : vector<8x32xf32>
    %cst_59 = arith.constant 9.99999996E-13 : f32
    %143 = vector.broadcast %cst_59 : f32 to vector<8x1xf32>
    %144 = arith.addf %140, %143 : vector<8x1xf32>
    %145 = math.rsqrt %144 : vector<8x1xf32>
    %146 = vector.broadcast %145 : vector<8x1xf32> to vector<8x32xf32>
    %147 = arith.mulf %142, %146 : vector<8x32xf32>
    %148 = vector.broadcast %127 : vector<1x32xf32> to vector<8x32xf32>
    %149 = arith.mulf %147, %148 : vector<8x32xf32>
    %150 = vector.broadcast %129 : vector<1x32xf32> to vector<8x32xf32>
    %151 = arith.addf %149, %150 : vector<8x32xf32>
    %c0_60 = arith.constant 0 : index
    %c0_61 = arith.constant 0 : index
    %c0_62 = arith.constant 0 : index
    %152 = vector.load %arg12[%c0_60, %c0_61, %c0_62] : memref<2x32x64xf32, #tpu.memory_space<vmem>>, vector<1x32x64xf32>
    %153 = vector.shape_cast %152 : vector<1x32x64xf32> to vector<32x64xf32>
    %cst_63 = arith.constant dense<0.000000e+00> : vector<8x64xf32>
    %154 = tpu.matmul %151, %153, %cst_63 {dimension_numbers = #tpu.dot_dimension_numbers<[1], [0], [0], [1], [0, 0, 1, 1], [], []>} : vector<8x32xf32>, vector<32x64xf32>, vector<8x64xf32> -> vector<8x64xf32>
    %c0_64 = arith.constant 0 : index
    %c0_65 = arith.constant 0 : index
    %c0_66 = arith.constant 0 : index
    %155 = vector.load %arg13[%c0_64, %c0_65, %c0_66] : memref<2x1x64xf32, #tpu.memory_space<vmem>>, vector<1x1x64xf32>
    %156 = vector.shape_cast %155 : vector<1x1x64xf32> to vector<1x64xf32>
    %157 = vector.broadcast %156 : vector<1x64xf32> to vector<8x64xf32>
    %158 = arith.addf %154, %157 : vector<8x64xf32>
    %159 = arith.mulf %158, %158 : vector<8x64xf32>
    %160 = arith.mulf %158, %159 : vector<8x64xf32>
    %cst_67 = arith.constant 4.471500e-02 : f32
    %161 = vector.broadcast %cst_67 : f32 to vector<8x64xf32>
    %162 = arith.mulf %161, %160 : vector<8x64xf32>
    %163 = arith.addf %158, %162 : vector<8x64xf32>
    %cst_68 = arith.constant 0.797884583 : f32
    %164 = vector.broadcast %cst_68 : f32 to vector<8x64xf32>
    %165 = arith.mulf %164, %163 : vector<8x64xf32>
    %166 = math.tanh %165 : vector<8x64xf32>
    %cst_69 = arith.constant 1.000000e+00 : f32
    %167 = vector.broadcast %cst_69 : f32 to vector<8x64xf32>
    %168 = arith.addf %167, %166 : vector<8x64xf32>
    %cst_70 = arith.constant 5.000000e-01 : f32
    %169 = vector.broadcast %cst_70 : f32 to vector<8x64xf32>
    %170 = arith.mulf %169, %168 : vector<8x64xf32>
    %171 = arith.mulf %158, %170 : vector<8x64xf32>
    %c0_71 = arith.constant 0 : index
    %c0_72 = arith.constant 0 : index
    %c0_73 = arith.constant 0 : index
    %172 = vector.load %arg14[%c0_71, %c0_72, %c0_73] : memref<2x64x32xf32, #tpu.memory_space<vmem>>, vector<1x64x32xf32>
    %173 = vector.shape_cast %172 : vector<1x64x32xf32> to vector<64x32xf32>
    %cst_74 = arith.constant dense<0.000000e+00> : vector<8x32xf32>
    %174 = tpu.matmul %171, %173, %cst_74 {dimension_numbers = #tpu.dot_dimension_numbers<[1], [0], [0], [1], [0, 0, 1, 1], [], []>} : vector<8x64xf32>, vector<64x32xf32>, vector<8x32xf32> -> vector<8x32xf32>
    %c0_75 = arith.constant 0 : index
    %c0_76 = arith.constant 0 : index
    %c0_77 = arith.constant 0 : index
    %175 = vector.load %arg15[%c0_75, %c0_76, %c0_77] : memref<2x1x32xf32, #tpu.memory_space<vmem>>, vector<1x1x32xf32>
    %176 = vector.shape_cast %175 : vector<1x1x32xf32> to vector<1x32xf32>
    %177 = vector.broadcast %176 : vector<1x32xf32> to vector<8x32xf32>
    %178 = arith.addf %174, %177 : vector<8x32xf32>
    %179 = arith.addf %178, %151 : vector<8x32xf32>
    %c0_78 = arith.constant 0 : index
    %c0_79 = arith.constant 0 : index
    %c0_80 = arith.constant 0 : index
    %180 = vector.load %arg16[%c0_78, %c0_79, %c0_80] : memref<2x1x32xf32, #tpu.memory_space<vmem>>, vector<1x1x32xf32>
    %181 = vector.shape_cast %180 : vector<1x1x32xf32> to vector<1x32xf32>
    %c0_81 = arith.constant 0 : index
    %c0_82 = arith.constant 0 : index
    %c0_83 = arith.constant 0 : index
    %182 = vector.load %arg17[%c0_81, %c0_82, %c0_83] : memref<2x1x32xf32, #tpu.memory_space<vmem>>, vector<1x1x32xf32>
    %183 = vector.shape_cast %182 : vector<1x1x32xf32> to vector<1x32xf32>
    %cst_84 = arith.constant dense<0.000000e+00> : vector<8xf32>
    %184 = vector.multi_reduction <add>, %179, %cst_84 [1] : vector<8x32xf32> to vector<8xf32>
    %185 = vector.shape_cast %184 : vector<8xf32> to vector<8x1xf32>
    %cst_85 = arith.constant 3.200000e+01 : f32
    %186 = vector.broadcast %cst_85 : f32 to vector<8x1xf32>
    %187 = arith.divf %185, %186 : vector<8x1xf32>
    %188 = vector.broadcast %187 : vector<8x1xf32> to vector<8x32xf32>
    %189 = arith.subf %179, %188 : vector<8x32xf32>
    %190 = arith.mulf %189, %189 : vector<8x32xf32>
    %cst_86 = arith.constant dense<0.000000e+00> : vector<8xf32>
    %191 = vector.multi_reduction <add>, %190, %cst_86 [1] : vector<8x32xf32> to vector<8xf32>
    %192 = vector.shape_cast %191 : vector<8xf32> to vector<8x1xf32>
    %cst_87 = arith.constant 3.200000e+01 : f32
    %193 = vector.broadcast %cst_87 : f32 to vector<8x1xf32>
    %194 = arith.divf %192, %193 : vector<8x1xf32>
    %195 = vector.broadcast %187 : vector<8x1xf32> to vector<8x32xf32>
    %196 = arith.subf %179, %195 : vector<8x32xf32>
    %cst_88 = arith.constant 9.99999996E-13 : f32
    %197 = vector.broadcast %cst_88 : f32 to vector<8x1xf32>
    %198 = arith.addf %194, %197 : vector<8x1xf32>
    %199 = math.rsqrt %198 : vector<8x1xf32>
    %200 = vector.broadcast %199 : vector<8x1xf32> to vector<8x32xf32>
    %201 = arith.mulf %196, %200 : vector<8x32xf32>
    %202 = vector.broadcast %181 : vector<1x32xf32> to vector<8x32xf32>
    %203 = arith.mulf %201, %202 : vector<8x32xf32>
    %204 = vector.broadcast %183 : vector<1x32xf32> to vector<8x32xf32>
    %205 = arith.addf %203, %204 : vector<8x32xf32>
    %c1 = arith.constant 1 : index
    %c0_89 = arith.constant 0 : index
    %c0_90 = arith.constant 0 : index
    %206 = vector.load %arg6[%c1, %c0_89, %c0_90] : memref<2x32x96xf32, #tpu.memory_space<vmem>>, vector<1x32x96xf32>
    %207 = vector.shape_cast %206 : vector<1x32x96xf32> to vector<32x96xf32>
    %cst_91 = arith.constant dense<0.000000e+00> : vector<8x96xf32>
    %208 = tpu.matmul %205, %207, %cst_91 {dimension_numbers = #tpu.dot_dimension_numbers<[1], [0], [0], [1], [0, 0, 1, 1], [], []>} : vector<8x32xf32>, vector<32x96xf32>, vector<8x96xf32> -> vector<8x96xf32>
    %c1_92 = arith.constant 1 : index
    %c0_93 = arith.constant 0 : index
    %c0_94 = arith.constant 0 : index
    %209 = vector.load %arg7[%c1_92, %c0_93, %c0_94] : memref<2x1x96xf32, #tpu.memory_space<vmem>>, vector<1x1x96xf32>
    %210 = vector.shape_cast %209 : vector<1x1x96xf32> to vector<1x96xf32>
    %211 = vector.broadcast %210 : vector<1x96xf32> to vector<8x96xf32>
    %212 = arith.addf %208, %211 : vector<8x96xf32>
    %213 = vector.extract_strided_slice %212 {offsets = [0, 0], sizes = [8, 8], strides = [1, 1]} : vector<8x96xf32> to vector<8x8xf32>
    %214 = vector.extract_strided_slice %212 {offsets = [0, 32], sizes = [8, 8], strides = [1, 1]} : vector<8x96xf32> to vector<8x8xf32>
    %215 = vector.extract_strided_slice %212 {offsets = [0, 64], sizes = [8, 8], strides = [1, 1]} : vector<8x96xf32> to vector<8x8xf32>
    %216 = tpu.transpose %214, [1, 0] : vector<8x8xf32> -> vector<8x8xf32>
    %cst_95 = arith.constant dense<0.000000e+00> : vector<8x8xf32>
    %217 = tpu.matmul %213, %216, %cst_95 {dimension_numbers = #tpu.dot_dimension_numbers<[1], [0], [0], [1], [0, 0, 1, 1], [], []>} : vector<8x8xf32>, vector<8x8xf32>, vector<8x8xf32> -> vector<8x8xf32>
    %cst_96 = arith.constant 0.353553385 : f32
    %218 = vector.broadcast %cst_96 : f32 to vector<8x8xf32>
    %219 = arith.mulf %217, %218 : vector<8x8xf32>
    %220 = vector.broadcast %29 : vector<1x8xf32> to vector<8x8xf32>
    %221 = arith.addf %219, %220 : vector<8x8xf32>
    %cst_97 = arith.constant dense<0xFF800000> : vector<8xf32>
    %222 = vector.multi_reduction <maximumf>, %221, %cst_97 [1] : vector<8x8xf32> to vector<8xf32>
    %223 = vector.shape_cast %222 : vector<8xf32> to vector<8x1xf32>
    %224 = vector.broadcast %223 : vector<8x1xf32> to vector<8x8xf32>
    %225 = arith.subf %221, %224 : vector<8x8xf32>
    %226 = math.exp %225 : vector<8x8xf32>
    %cst_98 = arith.constant dense<0.000000e+00> : vector<8xf32>
    %227 = vector.multi_reduction <add>, %226, %cst_98 [1] : vector<8x8xf32> to vector<8xf32>
    %228 = vector.shape_cast %227 : vector<8xf32> to vector<8x1xf32>
    %229 = tpu.reciprocal %228 {approx = true} : vector<8x1xf32> -> vector<8x1xf32>
    %230 = vector.broadcast %229 : vector<8x1xf32> to vector<8x8xf32>
    %231 = arith.mulf %226, %230 : vector<8x8xf32>
    %cst_99 = arith.constant dense<0.000000e+00> : vector<8x8xf32>
    %232 = tpu.matmul %231, %215, %cst_99 {dimension_numbers = #tpu.dot_dimension_numbers<[1], [0], [0], [1], [0, 0, 1, 1], [], []>} : vector<8x8xf32>, vector<8x8xf32>, vector<8x8xf32> -> vector<8x8xf32>
    %233 = vector.extract_strided_slice %212 {offsets = [0, 8], sizes = [8, 8], strides = [1, 1]} : vector<8x96xf32> to vector<8x8xf32>
    %234 = vector.extract_strided_slice %212 {offsets = [0, 40], sizes = [8, 8], strides = [1, 1]} : vector<8x96xf32> to vector<8x8xf32>
    %235 = vector.extract_strided_slice %212 {offsets = [0, 72], sizes = [8, 8], strides = [1, 1]} : vector<8x96xf32> to vector<8x8xf32>
    %236 = tpu.transpose %234, [1, 0] : vector<8x8xf32> -> vector<8x8xf32>
    %cst_100 = arith.constant dense<0.000000e+00> : vector<8x8xf32>
    %237 = tpu.matmul %233, %236, %cst_100 {dimension_numbers = #tpu.dot_dimension_numbers<[1], [0], [0], [1], [0, 0, 1, 1], [], []>} : vector<8x8xf32>, vector<8x8xf32>, vector<8x8xf32> -> vector<8x8xf32>
    %cst_101 = arith.constant 0.353553385 : f32
    %238 = vector.broadcast %cst_101 : f32 to vector<8x8xf32>
    %239 = arith.mulf %237, %238 : vector<8x8xf32>
    %240 = vector.broadcast %29 : vector<1x8xf32> to vector<8x8xf32>
    %241 = arith.addf %239, %240 : vector<8x8xf32>
    %cst_102 = arith.constant dense<0xFF800000> : vector<8xf32>
    %242 = vector.multi_reduction <maximumf>, %241, %cst_102 [1] : vector<8x8xf32> to vector<8xf32>
    %243 = vector.shape_cast %242 : vector<8xf32> to vector<8x1xf32>
    %244 = vector.broadcast %243 : vector<8x1xf32> to vector<8x8xf32>
    %245 = arith.subf %241, %244 : vector<8x8xf32>
    %246 = math.exp %245 : vector<8x8xf32>
    %cst_103 = arith.constant dense<0.000000e+00> : vector<8xf32>
    %247 = vector.multi_reduction <add>, %246, %cst_103 [1] : vector<8x8xf32> to vector<8xf32>
    %248 = vector.shape_cast %247 : vector<8xf32> to vector<8x1xf32>
    %249 = tpu.reciprocal %248 {approx = true} : vector<8x1xf32> -> vector<8x1xf32>
    %250 = vector.broadcast %249 : vector<8x1xf32> to vector<8x8xf32>
    %251 = arith.mulf %246, %250 : vector<8x8xf32>
    %cst_104 = arith.constant dense<0.000000e+00> : vector<8x8xf32>
    %252 = tpu.matmul %251, %235, %cst_104 {dimension_numbers = #tpu.dot_dimension_numbers<[1], [0], [0], [1], [0, 0, 1, 1], [], []>} : vector<8x8xf32>, vector<8x8xf32>, vector<8x8xf32> -> vector<8x8xf32>
    %253 = vector.extract_strided_slice %212 {offsets = [0, 16], sizes = [8, 8], strides = [1, 1]} : vector<8x96xf32> to vector<8x8xf32>
    %254 = vector.extract_strided_slice %212 {offsets = [0, 48], sizes = [8, 8], strides = [1, 1]} : vector<8x96xf32> to vector<8x8xf32>
    %255 = vector.extract_strided_slice %212 {offsets = [0, 80], sizes = [8, 8], strides = [1, 1]} : vector<8x96xf32> to vector<8x8xf32>
    %256 = tpu.transpose %254, [1, 0] : vector<8x8xf32> -> vector<8x8xf32>
    %cst_105 = arith.constant dense<0.000000e+00> : vector<8x8xf32>
    %257 = tpu.matmul %253, %256, %cst_105 {dimension_numbers = #tpu.dot_dimension_numbers<[1], [0], [0], [1], [0, 0, 1, 1], [], []>} : vector<8x8xf32>, vector<8x8xf32>, vector<8x8xf32> -> vector<8x8xf32>
    %cst_106 = arith.constant 0.353553385 : f32
    %258 = vector.broadcast %cst_106 : f32 to vector<8x8xf32>
    %259 = arith.mulf %257, %258 : vector<8x8xf32>
    %260 = vector.broadcast %29 : vector<1x8xf32> to vector<8x8xf32>
    %261 = arith.addf %259, %260 : vector<8x8xf32>
    %cst_107 = arith.constant dense<0xFF800000> : vector<8xf32>
    %262 = vector.multi_reduction <maximumf>, %261, %cst_107 [1] : vector<8x8xf32> to vector<8xf32>
    %263 = vector.shape_cast %262 : vector<8xf32> to vector<8x1xf32>
    %264 = vector.broadcast %263 : vector<8x1xf32> to vector<8x8xf32>
    %265 = arith.subf %261, %264 : vector<8x8xf32>
    %266 = math.exp %265 : vector<8x8xf32>
    %cst_108 = arith.constant dense<0.000000e+00> : vector<8xf32>
    %267 = vector.multi_reduction <add>, %266, %cst_108 [1] : vector<8x8xf32> to vector<8xf32>
    %268 = vector.shape_cast %267 : vector<8xf32> to vector<8x1xf32>
    %269 = tpu.reciprocal %268 {approx = true} : vector<8x1xf32> -> vector<8x1xf32>
    %270 = vector.broadcast %269 : vector<8x1xf32> to vector<8x8xf32>
    %271 = arith.mulf %266, %270 : vector<8x8xf32>
    %cst_109 = arith.constant dense<0.000000e+00> : vector<8x8xf32>
    %272 = tpu.matmul %271, %255, %cst_109 {dimension_numbers = #tpu.dot_dimension_numbers<[1], [0], [0], [1], [0, 0, 1, 1], [], []>} : vector<8x8xf32>, vector<8x8xf32>, vector<8x8xf32> -> vector<8x8xf32>
    %273 = vector.extract_strided_slice %212 {offsets = [0, 24], sizes = [8, 8], strides = [1, 1]} : vector<8x96xf32> to vector<8x8xf32>
    %274 = vector.extract_strided_slice %212 {offsets = [0, 56], sizes = [8, 8], strides = [1, 1]} : vector<8x96xf32> to vector<8x8xf32>
    %275 = vector.extract_strided_slice %212 {offsets = [0, 88], sizes = [8, 8], strides = [1, 1]} : vector<8x96xf32> to vector<8x8xf32>
    %276 = tpu.transpose %274, [1, 0] : vector<8x8xf32> -> vector<8x8xf32>
    %cst_110 = arith.constant dense<0.000000e+00> : vector<8x8xf32>
    %277 = tpu.matmul %273, %276, %cst_110 {dimension_numbers = #tpu.dot_dimension_numbers<[1], [0], [0], [1], [0, 0, 1, 1], [], []>} : vector<8x8xf32>, vector<8x8xf32>, vector<8x8xf32> -> vector<8x8xf32>
    %cst_111 = arith.constant 0.353553385 : f32
    %278 = vector.broadcast %cst_111 : f32 to vector<8x8xf32>
    %279 = arith.mulf %277, %278 : vector<8x8xf32>
    %280 = vector.broadcast %29 : vector<1x8xf32> to vector<8x8xf32>
    %281 = arith.addf %279, %280 : vector<8x8xf32>
    %cst_112 = arith.constant dense<0xFF800000> : vector<8xf32>
    %282 = vector.multi_reduction <maximumf>, %281, %cst_112 [1] : vector<8x8xf32> to vector<8xf32>
    %283 = vector.shape_cast %282 : vector<8xf32> to vector<8x1xf32>
    %284 = vector.broadcast %283 : vector<8x1xf32> to vector<8x8xf32>
    %285 = arith.subf %281, %284 : vector<8x8xf32>
    %286 = math.exp %285 : vector<8x8xf32>
    %cst_113 = arith.constant dense<0.000000e+00> : vector<8xf32>
    %287 = vector.multi_reduction <add>, %286, %cst_113 [1] : vector<8x8xf32> to vector<8xf32>
    %288 = vector.shape_cast %287 : vector<8xf32> to vector<8x1xf32>
    %289 = tpu.reciprocal %288 {approx = true} : vector<8x1xf32> -> vector<8x1xf32>
    %290 = vector.broadcast %289 : vector<8x1xf32> to vector<8x8xf32>
    %291 = arith.mulf %286, %290 : vector<8x8xf32>
    %cst_114 = arith.constant dense<0.000000e+00> : vector<8x8xf32>
    %292 = tpu.matmul %291, %275, %cst_114 {dimension_numbers = #tpu.dot_dimension_numbers<[1], [0], [0], [1], [0, 0, 1, 1], [], []>} : vector<8x8xf32>, vector<8x8xf32>, vector<8x8xf32> -> vector<8x8xf32>
    %293 = tpu.concatenate %232, %252, %272, %292 in 1 : vector<8x8xf32>, vector<8x8xf32>, vector<8x8xf32>, vector<8x8xf32> -> vector<8x32xf32>
    %c1_115 = arith.constant 1 : index
    %c0_116 = arith.constant 0 : index
    %c0_117 = arith.constant 0 : index
    %294 = vector.load %arg8[%c1_115, %c0_116, %c0_117] : memref<2x32x32xf32, #tpu.memory_space<vmem>>, vector<1x32x32xf32>
    %295 = vector.shape_cast %294 : vector<1x32x32xf32> to vector<32x32xf32>
    %cst_118 = arith.constant dense<0.000000e+00> : vector<8x32xf32>
    %296 = tpu.matmul %293, %295, %cst_118 {dimension_numbers = #tpu.dot_dimension_numbers<[1], [0], [0], [1], [0, 0, 1, 1], [], []>} : vector<8x32xf32>, vector<32x32xf32>, vector<8x32xf32> -> vector<8x32xf32>
    %c1_119 = arith.constant 1 : index
    %c0_120 = arith.constant 0 : index
    %c0_121 = arith.constant 0 : index
    %297 = vector.load %arg9[%c1_119, %c0_120, %c0_121] : memref<2x1x32xf32, #tpu.memory_space<vmem>>, vector<1x1x32xf32>
    %298 = vector.shape_cast %297 : vector<1x1x32xf32> to vector<1x32xf32>
    %299 = vector.broadcast %298 : vector<1x32xf32> to vector<8x32xf32>
    %300 = arith.addf %296, %299 : vector<8x32xf32>
    %301 = arith.addf %300, %205 : vector<8x32xf32>
    %c1_122 = arith.constant 1 : index
    %c0_123 = arith.constant 0 : index
    %c0_124 = arith.constant 0 : index
    %302 = vector.load %arg10[%c1_122, %c0_123, %c0_124] : memref<2x1x32xf32, #tpu.memory_space<vmem>>, vector<1x1x32xf32>
    %303 = vector.shape_cast %302 : vector<1x1x32xf32> to vector<1x32xf32>
    %c1_125 = arith.constant 1 : index
    %c0_126 = arith.constant 0 : index
    %c0_127 = arith.constant 0 : index
    %304 = vector.load %arg11[%c1_125, %c0_126, %c0_127] : memref<2x1x32xf32, #tpu.memory_space<vmem>>, vector<1x1x32xf32>
    %305 = vector.shape_cast %304 : vector<1x1x32xf32> to vector<1x32xf32>
    %cst_128 = arith.constant dense<0.000000e+00> : vector<8xf32>
    %306 = vector.multi_reduction <add>, %301, %cst_128 [1] : vector<8x32xf32> to vector<8xf32>
    %307 = vector.shape_cast %306 : vector<8xf32> to vector<8x1xf32>
    %cst_129 = arith.constant 3.200000e+01 : f32
    %308 = vector.broadcast %cst_129 : f32 to vector<8x1xf32>
    %309 = arith.divf %307, %308 : vector<8x1xf32>
    %310 = vector.broadcast %309 : vector<8x1xf32> to vector<8x32xf32>
    %311 = arith.subf %301, %310 : vector<8x32xf32>
    %312 = arith.mulf %311, %311 : vector<8x32xf32>
    %cst_130 = arith.constant dense<0.000000e+00> : vector<8xf32>
    %313 = vector.multi_reduction <add>, %312, %cst_130 [1] : vector<8x32xf32> to vector<8xf32>
    %314 = vector.shape_cast %313 : vector<8xf32> to vector<8x1xf32>
    %cst_131 = arith.constant 3.200000e+01 : f32
    %315 = vector.broadcast %cst_131 : f32 to vector<8x1xf32>
    %316 = arith.divf %314, %315 : vector<8x1xf32>
    %317 = vector.broadcast %309 : vector<8x1xf32> to vector<8x32xf32>
    %318 = arith.subf %301, %317 : vector<8x32xf32>
    %cst_132 = arith.constant 9.99999996E-13 : f32
    %319 = vector.broadcast %cst_132 : f32 to vector<8x1xf32>
    %320 = arith.addf %316, %319 : vector<8x1xf32>
    %321 = math.rsqrt %320 : vector<8x1xf32>
    %322 = vector.broadcast %321 : vector<8x1xf32> to vector<8x32xf32>
    %323 = arith.mulf %318, %322 : vector<8x32xf32>
    %324 = vector.broadcast %303 : vector<1x32xf32> to vector<8x32xf32>
    %325 = arith.mulf %323, %324 : vector<8x32xf32>
    %326 = vector.broadcast %305 : vector<1x32xf32> to vector<8x32xf32>
    %327 = arith.addf %325, %326 : vector<8x32xf32>
    %c1_133 = arith.constant 1 : index
    %c0_134 = arith.constant 0 : index
    %c0_135 = arith.constant 0 : index
    %328 = vector.load %arg12[%c1_133, %c0_134, %c0_135] : memref<2x32x64xf32, #tpu.memory_space<vmem>>, vector<1x32x64xf32>
    %329 = vector.shape_cast %328 : vector<1x32x64xf32> to vector<32x64xf32>
    %cst_136 = arith.constant dense<0.000000e+00> : vector<8x64xf32>
    %330 = tpu.matmul %327, %329, %cst_136 {dimension_numbers = #tpu.dot_dimension_numbers<[1], [0], [0], [1], [0, 0, 1, 1], [], []>} : vector<8x32xf32>, vector<32x64xf32>, vector<8x64xf32> -> vector<8x64xf32>
    %c1_137 = arith.constant 1 : index
    %c0_138 = arith.constant 0 : index
    %c0_139 = arith.constant 0 : index
    %331 = vector.load %arg13[%c1_137, %c0_138, %c0_139] : memref<2x1x64xf32, #tpu.memory_space<vmem>>, vector<1x1x64xf32>
    %332 = vector.shape_cast %331 : vector<1x1x64xf32> to vector<1x64xf32>
    %333 = vector.broadcast %332 : vector<1x64xf32> to vector<8x64xf32>
    %334 = arith.addf %330, %333 : vector<8x64xf32>
    %335 = arith.mulf %334, %334 : vector<8x64xf32>
    %336 = arith.mulf %334, %335 : vector<8x64xf32>
    %cst_140 = arith.constant 4.471500e-02 : f32
    %337 = vector.broadcast %cst_140 : f32 to vector<8x64xf32>
    %338 = arith.mulf %337, %336 : vector<8x64xf32>
    %339 = arith.addf %334, %338 : vector<8x64xf32>
    %cst_141 = arith.constant 0.797884583 : f32
    %340 = vector.broadcast %cst_141 : f32 to vector<8x64xf32>
    %341 = arith.mulf %340, %339 : vector<8x64xf32>
    %342 = math.tanh %341 : vector<8x64xf32>
    %cst_142 = arith.constant 1.000000e+00 : f32
    %343 = vector.broadcast %cst_142 : f32 to vector<8x64xf32>
    %344 = arith.addf %343, %342 : vector<8x64xf32>
    %cst_143 = arith.constant 5.000000e-01 : f32
    %345 = vector.broadcast %cst_143 : f32 to vector<8x64xf32>
    %346 = arith.mulf %345, %344 : vector<8x64xf32>
    %347 = arith.mulf %334, %346 : vector<8x64xf32>
    %c1_144 = arith.constant 1 : index
    %c0_145 = arith.constant 0 : index
    %c0_146 = arith.constant 0 : index
    %348 = vector.load %arg14[%c1_144, %c0_145, %c0_146] : memref<2x64x32xf32, #tpu.memory_space<vmem>>, vector<1x64x32xf32>
    %349 = vector.shape_cast %348 : vector<1x64x32xf32> to vector<64x32xf32>
    %cst_147 = arith.constant dense<0.000000e+00> : vector<8x32xf32>
    %350 = tpu.matmul %347, %349, %cst_147 {dimension_numbers = #tpu.dot_dimension_numbers<[1], [0], [0], [1], [0, 0, 1, 1], [], []>} : vector<8x64xf32>, vector<64x32xf32>, vector<8x32xf32> -> vector<8x32xf32>
    %c1_148 = arith.constant 1 : index
    %c0_149 = arith.constant 0 : index
    %c0_150 = arith.constant 0 : index
    %351 = vector.load %arg15[%c1_148, %c0_149, %c0_150] : memref<2x1x32xf32, #tpu.memory_space<vmem>>, vector<1x1x32xf32>
    %352 = vector.shape_cast %351 : vector<1x1x32xf32> to vector<1x32xf32>
    %353 = vector.broadcast %352 : vector<1x32xf32> to vector<8x32xf32>
    %354 = arith.addf %350, %353 : vector<8x32xf32>
    %355 = arith.addf %354, %327 : vector<8x32xf32>
    %c1_151 = arith.constant 1 : index
    %c0_152 = arith.constant 0 : index
    %c0_153 = arith.constant 0 : index
    %356 = vector.load %arg16[%c1_151, %c0_152, %c0_153] : memref<2x1x32xf32, #tpu.memory_space<vmem>>, vector<1x1x32xf32>
    %357 = vector.shape_cast %356 : vector<1x1x32xf32> to vector<1x32xf32>
    %c1_154 = arith.constant 1 : index
    %c0_155 = arith.constant 0 : index
    %c0_156 = arith.constant 0 : index
    %358 = vector.load %arg17[%c1_154, %c0_155, %c0_156] : memref<2x1x32xf32, #tpu.memory_space<vmem>>, vector<1x1x32xf32>
    %359 = vector.shape_cast %358 : vector<1x1x32xf32> to vector<1x32xf32>
    %cst_157 = arith.constant dense<0.000000e+00> : vector<8xf32>
    %360 = vector.multi_reduction <add>, %355, %cst_157 [1] : vector<8x32xf32> to vector<8xf32>
    %361 = vector.shape_cast %360 : vector<8xf32> to vector<8x1xf32>
    %cst_158 = arith.constant 3.200000e+01 : f32
    %362 = vector.broadcast %cst_158 : f32 to vector<8x1xf32>
    %363 = arith.divf %361, %362 : vector<8x1xf32>
    %364 = vector.broadcast %363 : vector<8x1xf32> to vector<8x32xf32>
    %365 = arith.subf %355, %364 : vector<8x32xf32>
    %366 = arith.mulf %365, %365 : vector<8x32xf32>
    %cst_159 = arith.constant dense<0.000000e+00> : vector<8xf32>
    %367 = vector.multi_reduction <add>, %366, %cst_159 [1] : vector<8x32xf32> to vector<8xf32>
    %368 = vector.shape_cast %367 : vector<8xf32> to vector<8x1xf32>
    %cst_160 = arith.constant 3.200000e+01 : f32
    %369 = vector.broadcast %cst_160 : f32 to vector<8x1xf32>
    %370 = arith.divf %368, %369 : vector<8x1xf32>
    %371 = vector.broadcast %363 : vector<8x1xf32> to vector<8x32xf32>
    %372 = arith.subf %355, %371 : vector<8x32xf32>
    %cst_161 = arith.constant 9.99999996E-13 : f32
    %373 = vector.broadcast %cst_161 : f32 to vector<8x1xf32>
    %374 = arith.addf %370, %373 : vector<8x1xf32>
    %375 = math.rsqrt %374 : vector<8x1xf32>
    %376 = vector.broadcast %375 : vector<8x1xf32> to vector<8x32xf32>
    %377 = arith.mulf %372, %376 : vector<8x32xf32>
    %378 = vector.broadcast %357 : vector<1x32xf32> to vector<8x32xf32>
    %379 = arith.mulf %377, %378 : vector<8x32xf32>
    %380 = vector.broadcast %359 : vector<1x32xf32> to vector<8x32xf32>
    %381 = arith.addf %379, %380 : vector<8x32xf32>
    %382 = vector.extract_strided_slice %381 {offsets = [0, 0], sizes = [1, 32], strides = [1, 1]} : vector<8x32xf32> to vector<1x32xf32>
    %c0_162 = arith.constant 0 : index
    %c0_163 = arith.constant 0 : index
    %383 = vector.load %arg18[%c0_162, %c0_163] : memref<32x32xf32, #tpu.memory_space<vmem>>, vector<32x32xf32>
    %cst_164 = arith.constant dense<0.000000e+00> : vector<1x32xf32>
    %384 = tpu.matmul %382, %383, %cst_164 {dimension_numbers = #tpu.dot_dimension_numbers<[1], [0], [0], [1], [0, 0, 1, 1], [], []>} : vector<1x32xf32>, vector<32x32xf32>, vector<1x32xf32> -> vector<1x32xf32>
    %c0_165 = arith.constant 0 : index
    %c0_166 = arith.constant 0 : index
    %385 = vector.load %arg19[%c0_165, %c0_166] : memref<1x32xf32, #tpu.memory_space<vmem>>, vector<1x32xf32>
    %386 = arith.addf %384, %385 : vector<1x32xf32>
    %c0_167 = arith.constant 0 : index
    %c0_168 = arith.constant 0 : index
    %387 = vector.load %arg20[%c0_167, %c0_168] : memref<1x32xf32, #tpu.memory_space<vmem>>, vector<1x32xf32>
    %c0_169 = arith.constant 0 : index
    %c0_170 = arith.constant 0 : index
    %388 = vector.load %arg21[%c0_169, %c0_170] : memref<1x32xf32, #tpu.memory_space<vmem>>, vector<1x32xf32>
    %cst_171 = arith.constant dense<0.000000e+00> : vector<1xf32>
    %389 = vector.multi_reduction <add>, %386, %cst_171 [1] : vector<1x32xf32> to vector<1xf32>
    %390 = vector.shape_cast %389 : vector<1xf32> to vector<1x1xf32>
    %cst_172 = arith.constant 3.200000e+01 : f32
    %391 = vector.broadcast %cst_172 : f32 to vector<1x1xf32>
    %392 = arith.divf %390, %391 : vector<1x1xf32>
    %393 = vector.broadcast %392 : vector<1x1xf32> to vector<1x32xf32>
    %394 = arith.subf %386, %393 : vector<1x32xf32>
    %395 = arith.mulf %394, %394 : vector<1x32xf32>
    %cst_173 = arith.constant dense<0.000000e+00> : vector<1xf32>
    %396 = vector.multi_reduction <add>, %395, %cst_173 [1] : vector<1x32xf32> to vector<1xf32>
    %397 = vector.shape_cast %396 : vector<1xf32> to vector<1x1xf32>
    %cst_174 = arith.constant 3.200000e+01 : f32
    %398 = vector.broadcast %cst_174 : f32 to vector<1x1xf32>
    %399 = arith.divf %397, %398 : vector<1x1xf32>
    %400 = vector.broadcast %392 : vector<1x1xf32> to vector<1x32xf32>
    %401 = arith.subf %386, %400 : vector<1x32xf32>
    %cst_175 = arith.constant 9.99999974E-6 : f32
    %402 = vector.broadcast %cst_175 : f32 to vector<1x1xf32>
    %403 = arith.addf %399, %402 : vector<1x1xf32>
    %404 = math.rsqrt %403 : vector<1x1xf32>
    %405 = vector.broadcast %404 : vector<1x1xf32> to vector<1x32xf32>
    %406 = arith.mulf %401, %405 : vector<1x32xf32>
    %407 = arith.mulf %406, %387 : vector<1x32xf32>
    %408 = arith.addf %407, %388 : vector<1x32xf32>
    %c0_176 = arith.constant 0 : index
    %c0_177 = arith.constant 0 : index
    %c0_178 = arith.constant 0 : index
    %409 = vector.load %arg22[%c0_176, %c0_177, %c0_178] : memref<1x1x32xf32, #tpu.memory_space<vmem>>, vector<1x1x32xf32>
    %410 = vector.shape_cast %409 : vector<1x1x32xf32> to vector<1x32xf32>
    %411 = vector.shape_cast %408 : vector<1x32xf32> to vector<1x1x32xf32>
    tpu.vector_store %arg22[%c0_176, %c0_177, %c0_178], %411 {strides = array<i32>} : memref<1x1x32xf32, #tpu.memory_space<vmem>>, vector<1x1x32xf32>,
    return
  }
  func.func @transform_0(%arg0: i32) -> (i32, i32, i32) {
    %c0_i32 = arith.constant 0 : i32
    %c0_i32_0 = arith.constant 0 : i32
    %c0_i32_1 = arith.constant 0 : i32
    return %arg0, %c0_i32, %c0_i32_0 : i32, i32, i32
  }
  func.func @transform_1(%arg0: i32) -> (i32, i32) {
    %c0_i32 = arith.constant 0 : i32
    %c0_i32_0 = arith.constant 0 : i32
    %c0_i32_1 = arith.constant 0 : i32
    return %c0_i32, %c0_i32_0 : i32, i32
  }
  func.func @transform_2(%arg0: i32) -> (i32, i32, i32) {
    %c0_i32 = arith.constant 0 : i32
    %c0_i32_0 = arith.constant 0 : i32
    %c0_i32_1 = arith.constant 0 : i32
    return %arg0, %c0_i32, %c0_i32_0 : i32, i32, i32
  }
  func.func @transform_3(%arg0: i32) -> (i32, i32) {
    %c0_i32 = arith.constant 0 : i32
    %c0_i32_0 = arith.constant 0 : i32
    %c0_i32_1 = arith.constant 0 : i32
    return %c0_i32, %c0_i32_0 : i32, i32
  }
  func.func @transform_4(%arg0: i32) -> (i32, i32) {
    %c0_i32 = arith.constant 0 : i32
    %c0_i32_0 = arith.constant 0 : i32
    %c0_i32_1 = arith.constant 0 : i32
    return %c0_i32, %c0_i32_0 : i32, i32
  }
  func.func @transform_5(%arg0: i32) -> (i32, i32, i32) {
    %c0_i32 = arith.constant 0 : i32
    %c0_i32_0 = arith.constant 0 : i32
    %c0_i32_1 = arith.constant 0 : i32
    %c0_i32_2 = arith.constant 0 : i32
    return %c0_i32, %c0_i32_0, %c0_i32_1 : i32, i32, i32
  }
  func.func @transform_6(%arg0: i32) -> (i32, i32, i32) {
    %c0_i32 = arith.constant 0 : i32
    %c0_i32_0 = arith.constant 0 : i32
    %c0_i32_1 = arith.constant 0 : i32
    %c0_i32_2 = arith.constant 0 : i32
    return %c0_i32, %c0_i32_0, %c0_i32_1 : i32, i32, i32
  }
  func.func @transform_7(%arg0: i32) -> (i32, i32, i32) {
    %c0_i32 = arith.constant 0 : i32
    %c0_i32_0 = arith.constant 0 : i32
    %c0_i32_1 = arith.constant 0 : i32
    %c0_i32_2 = arith.constant 0 : i32
    return %c0_i32, %c0_i32_0, %c0_i32_1 : i32, i32, i32
  }
  func.func @transform_8(%arg0: i32) -> (i32, i32, i32) {
    %c0_i32 = arith.constant 0 : i32
    %c0_i32_0 = arith.constant 0 : i32
    %c0_i32_1 = arith.constant 0 : i32
    %c0_i32_2 = arith.constant 0 : i32
    return %c0_i32, %c0_i32_0, %c0_i32_1 : i32, i32, i32
  }
  func.func @transform_9(%arg0: i32) -> (i32, i32, i32) {
    %c0_i32 = arith.constant 0 : i32
    %c0_i32_0 = arith.constant 0 : i32
    %c0_i32_1 = arith.constant 0 : i32
    %c0_i32_2 = arith.constant 0 : i32
    return %c0_i32, %c0_i32_0, %c0_i32_1 : i32, i32, i32
  }
  func.func @transform_10(%arg0: i32) -> (i32, i32, i32) {
    %c0_i32 = arith.constant 0 : i32
    %c0_i32_0 = arith.constant 0 : i32
    %c0_i32_1 = arith.constant 0 : i32
    %c0_i32_2 = arith.constant 0 : i32
    return %c0_i32, %c0_i32_0, %c0_i32_1 : i32, i32, i32
  }
  func.func @transform_11(%arg0: i32) -> (i32, i32, i32) {
    %c0_i32 = arith.constant 0 : i32
    %c0_i32_0 = arith.constant 0 : i32
    %c0_i32_1 = arith.constant 0 : i32
    %c0_i32_2 = arith.constant 0 : i32
    return %c0_i32, %c0_i32_0, %c0_i32_1 : i32, i32, i32
  }
  func.func @transform_12(%arg0: i32) -> (i32, i32, i32) {
    %c0_i32 = arith.constant 0 : i32
    %c0_i32_0 = arith.constant 0 : i32
    %c0_i32_1 = arith.constant 0 : i32
    %c0_i32_2 = arith.constant 0 : i32
    return %c0_i32, %c0_i32_0, %c0_i32_1 : i32, i32, i32
  }
  func.func @transform_13(%arg0: i32) -> (i32, i32, i32) {
    %c0_i32 = arith.constant 0 : i32
    %c0_i32_0 = arith.constant 0 : i32
    %c0_i32_1 = arith.constant 0 : i32
    %c0_i32_2 = arith.constant 0 : i32
    return %c0_i32, %c0_i32_0, %c0_i32_1 : i32, i32, i32
  }
  func.func @transform_14(%arg0: i32) -> (i32, i32, i32) {
    %c0_i32 = arith.constant 0 : i32
    %c0_i32_0 = arith.constant 0 : i32
    %c0_i32_1 = arith.constant 0 : i32
    %c0_i32_2 = arith.constant 0 : i32
    return %c0_i32, %c0_i32_0, %c0_i32_1 : i32, i32, i32
  }
  func.func @transform_15(%arg0: i32) -> (i32, i32, i32) {
    %c0_i32 = arith.constant 0 : i32
    %c0_i32_0 = arith.constant 0 : i32
    %c0_i32_1 = arith.constant 0 : i32
    %c0_i32_2 = arith.constant 0 : i32
    return %c0_i32, %c0_i32_0, %c0_i32_1 : i32, i32, i32
  }
  func.func @transform_16(%arg0: i32) -> (i32, i32, i32) {
    %c0_i32 = arith.constant 0 : i32
    %c0_i32_0 = arith.constant 0 : i32
    %c0_i32_1 = arith.constant 0 : i32
    %c0_i32_2 = arith.constant 0 : i32
    return %c0_i32, %c0_i32_0, %c0_i32_1 : i32, i32, i32
  }
  func.func @transform_17(%arg0: i32) -> (i32, i32) {
    %c0_i32 = arith.constant 0 : i32
    %c0_i32_0 = arith.constant 0 : i32
    %c0_i32_1 = arith.constant 0 : i32
    return %c0_i32, %c0_i32_0 : i32, i32
  }
  func.func @transform_18(%arg0: i32) -> (i32, i32) {
    %c0_i32 = arith.constant 0 : i32
    %c0_i32_0 = arith.constant 0 : i32
    %c0_i32_1 = arith.constant 0 : i32
    return %c0_i32, %c0_i32_0 : i32, i32
  }
  func.func @transform_19(%arg0: i32) -> (i32, i32) {
    %c0_i32 = arith.constant 0 : i32
    %c0_i32_0 = arith.constant 0 : i32
    %c0_i32_1 = arith.constant 0 : i32
    return %c0_i32, %c0_i32_0 : i32, i32
  }
  func.func @transform_20(%arg0: i32) -> (i32, i32) {
    %c0_i32 = arith.constant 0 : i32
    %c0_i32_0 = arith.constant 0 : i32
    %c0_i32_1 = arith.constant 0 : i32
    return %c0_i32, %c0_i32_0 : i32, i32
  }
  func.func @transform_21(%arg0: i32) -> (i32, i32, i32) {
    %c0_i32 = arith.constant 0 : i32
    %c0_i32_0 = arith.constant 0 : i32
    %c0_i32_1 = arith.constant 0 : i32
    return %arg0, %c0_i32, %c0_i32_0 : i32, i32, i32
  }
}

</mosaic_0001>

<bundles_post_ra>
// kernel: text_encoder_forward.1
= control target key start
LH: loop header
LB: loop body
LE: loop exit
PB: predicated region body
PF: predicated region fallthrough
CT: control target
= control target key end

     0   :  { %s4346_s0 = inlined_call_operand.vmem [shape: f32[2,8,32], index: 0, kind: input, shape index: {}]   ;;  %s4347_s1 = inlined_call_operand.vmem [shape: f32[8,32], index: 1, kind: input, shape index: {}]   ;;  %s4348_s2 = inlined_call_operand.vmem [shape: f32[2,1,8], index: 2, kind: input, shape index: {}]   ;;  %s4349_s3 = inlined_call_operand.vmem [shape: f32[1,32], index: 3, kind: input, shape index: {}]   ;;  %s4350_s4 = inlined_call_operand.vmem [shape: f32[1,32], index: 4, kind: input, shape index: {}]   ;;  %s4351_s5 = inlined_call_operand.vmem [shape: f32[2,32,96], index: 5, kind: input, shape index: {}]   ;;  %s4352_s6 = inlined_call_operand.vmem [shape: f32[2,1,96], index: 6, kind: input, shape index: {}]   ;;  %s4353_s7 = inlined_call_operand.vmem [shape: f32[2,32,32], index: 7, kind: input, shape index: {}]   ;;  %s4354_s8 = inlined_call_operand.vmem [shape: f32[2,1,32], index: 8, kind: input, shape index: {}]   ;;  %s4355_s9 = inlined_call_operand.vmem [shape: f32[2,1,32], index: 9, kind: input, shape index: {}]   ;;  %s4356_s10 = inlined_call_operand.vmem [shape: f32[2,1,32], index: 10, kind: input, shape index: {}]   ;;  %s4357_s11 = inlined_call_operand.vmem [shape: f32[2,32,64], index: 11, kind: input, shape index: {}]   ;;  %s4358_s12 = inlined_call_operand.vmem [shape: f32[2,1,64], index: 12, kind: input, shape index: {}]   ;;  %s4359_s13 = inlined_call_operand.vmem [shape: f32[2,64,32], index: 13, kind: input, shape index: {}]   ;;  %s4360_s14 = inlined_call_operand.vmem [shape: f32[2,1,32], index: 14, kind: input, shape index: {}]   ;;  %s4361_s15 = inlined_call_operand.vmem [shape: f32[2,1,32], index: 15, kind: input, shape index: {}]   ;;  %s4362_s16 = inlined_call_operand.vmem [shape: f32[2,1,32], index: 16, kind: input, shape index: {}]   ;;  %s4363_s17 = inlined_call_operand.vmem [shape: f32[32,32], index: 17, kind: input, shape index: {}]   ;;  %s4364_s18 = inlined_call_operand.vmem [shape: f32[1,32], index: 18, kind: input, shape index: {}]   ;;  %s4365_s19 = inlined_call_operand.vmem [shape: f32[1,32], index: 19, kind: input, shape index: {}]   ;;  %s4366_s20 = inlined_call_operand.vmem [shape: f32[1,32], index: 20, kind: input, shape index: {}]   ;;  %s4367_s21 = inlined_call_operand.hbm [shape: f32[2,1,32], index: 21, kind: output, shape index: {}]  }
   0x1   :  { %4386 = sst [smem:[#allocation9_spill]] %s4346_s0 }
   0x2   :  { %4387 = sst [smem:[#allocation10_spill]] %s4347_s1 }
   0x3   :  { %4388 = sst [smem:[#allocation11_spill]] %s4348_s2 }
   0x4   :  { %4389 = sst [smem:[#allocation12_spill]] %s4349_s3 }
   0x5   :  { %4390 = sst [smem:[#allocation13_spill]] %s4350_s4 }
   0x6   :  { %4391 = sst [smem:[#allocation14_spill]] %s4351_s5 }
   0x7   :  { %4392 = sst [smem:[#allocation15_spill]] %s4352_s6 }
   0x8   :  { %4393 = sst [smem:[#allocation16_spill]] %s4353_s7 }
   0x9   :  { %26 = vsyncpa [#allocation3], 0 }
   0xa   :  { %28 = vsyncpa [#allocation3 + $0x1], 0  ;;  %s3808_s2 = smov 0   ;;  %s3810_s25 = smov 0  }
   0xb   :  { %s3812_s26 = smov 0   ;;  %s3814_s27 = smov 0  }
   0xc LB: > { %4394 = sst [smem:[#allocation5_spill]] %s3674_s26  ;;  %s3829_s3 = sadd.s32 4294967295, %s3678_s27   ;;  %s3678_s27 = sphi %s3814_s27, %s4422_s27   ;;  %s3674_s26 = sphi %s3812_s26, %s4424_s26   ;;  %s3670_s25 = sphi %s3810_s25, %s4426_s25   ;;  %s3666_s2 = sphi %s3808_s2, %s4425_s2  }
   0xd   : > { %s3078_s28 = sadd.s32 4294967294, %s3678_s27   ;;  %s3833_s29 = sadd.s32 1, %s3678_s27  }
   0xe   : > { %4395 = sst [smem:[#allocation6_spill]] %s3833_s29  ;;  %s492_s0 = sadd.s32 1, %s3674_s26 }
   0xf   : > { %s489_s4 = ssub.s32 %s3678_s27, %s3833_s29  ;;  %p502_p0 = scmp.ne.s32.totalorder %s3674_s26, %s3670_s25 }
  0x10   : > { %p490_p1 = scmp.eq.s32.totalorder %s489_s4, 0  ;;  %p503_p2 = scmp.eq.s32.totalorder %s3829_s3, 1 }
  0x11   : > { %p508_p3 = scmp.ne.s32.totalorder %s3670_s25, %s3666_s2  ;;  %p509_p4 = scmp.eq.s32.totalorder %s3078_s28, 1 }
  0x12   : > { %s3844_s30 = scalar_select %p490_p1, %s3674_s26, %s492_s0  }
  0x13   : > { %p3846_p5 = por %p503_p2, %p502_p0  ;;  %p3850_p6 = por %p509_p4, %p508_p3 }
  0x14   : > { %4396 = sst [smem:[#allocation7_spill]] %s3844_s30  ;;  %p3081_p7 = scmp.ge.s32.totalorder %s3678_s27, 1 }
  0x15   : > { %s4398_s22 = scalar_select %p3850_p6, 1, 0 }
  0x16   : > { %p597_p8 = scmp.lt.s32.totalorder %s3678_s27, 3 }
  0x17   : > { %4399 = sst [smem:[#allocation8_spill]] %s4398_s22 }
  0x18   : > { %p598_p9 = pnand %p3081_p7, %p597_p8 }
  0x19   : > { %p658_p10 = scmp.lt.s32.totalorder (!%p598_p9), %s3829_s3, 1  ;;  %s4400_s0 = sld [smem:[#allocation10_spill]] (!%p598_p9)  ;;  %vm670_vm0 = vcmask (!%p598_p9), 261120   ;;  %v3680_v12 = vmov (!%p598_p9), 0.0|0.0   ;;  %vm3681_vm1 = vmmov (!%p598_p9), 0   ;;  %v3682_v15 = vmov (!%p598_p9), 0.0  }
  0x1a   : > { %601 = sbr.rel (%p598_p9) target bundleno = 6426 (0x191a), region = 104  ;;  %s4401_s26 = sld [smem:[#allocation9_spill]] (!%p598_p9)  ;;  %3446 = vmatprep.subr.bf16.mxu0 (!%p598_p9), %v3680_v12  ;;  %3259 = vmatprep.mubr.msk.f32.mxu0 (!%p598_p9), %vm3681_vm1, %v3682_v15  ;;  %vm787_vm2 = vcmask (!%p598_p9), 64512   ;;  %vm1471_vm3 = vcmask (!%p598_p9), 130048   ;;  %vm1473_vm4 = vcmask (!%p598_p9), 195584   ;;  %vm1697_vm5 = vcmask (!%p598_p9), 523264  }
  0x1b   : > { %s4402_s28 = sld [smem:[#allocation14_spill]] (!%p598_p9)  ;;  %3262 = vmatprep.subr.mxu1 (!%p598_p9), %v3682_v15  ;;  %3264 = vmatprep.mubr.msk.f32.mxu1 (!%p598_p9), %vm3681_vm1, %v3682_v15  ;;  %s4405_s6 = sld [smem:[#allocation15_spill]] (!%p598_p9)  ;;  %vm2984_vm6 = vcmask (!%p598_p9), 253952  }
  0x1c   : > { %s4373_s22 = smov (!%p598_p9), 64   ;;  %s4382_s24 = smov (!%p598_p9), 96  }
  0x1d   : > { %s4381_s30 = smov (!%p598_p9), 120   ;;  %s4407_s7 = sld [smem:[#allocation16_spill]] (!%p598_p9) }
  0x1f   : > { %v666_v0 = vld [vmem:[%s4400_s0] sm:$0xff] (!%p598_p9)  ;;  %s4403_s0 = sld [smem:[#allocation12_spill]] (!%p598_p9) }
  0x21   : > { %s3858_s23 = scalar_select %p658_p10, %s3829_s3, 1  ;;  %v700_v9 = vld [vmem:[%s4402_s28] sm:$0xff]  ;;  %v701_v10 = vld [vmem:[%s4402_s28 + $0x8] sm:$0xff]  ;;  %v702_v11 = vld [vmem:[%s4402_s28 + $0x10] sm:$0xff] }
  0x22   : > { %v3447_v13 = vpack.c.bf16 %v701_v10, %v700_v9  ;;  %v703_v14 = vld [vmem:[%s4402_s28 + $0x18] sm:$0xff]  ;;  %v3085_v26 = vld [vmem:[%s4405_s6] ss:$0 sm:$0xff] }
  0x23   : > { %s3082_s1 = sshll.u32 %s3858_s23, 3  ;;  %v3450_v16 = vpack.c.bf16 %v703_v14, %v702_v11 }
  0x24   : > { %s661_s29 = scalar_lea.vmem %s4401_s26, %s3082_s1  ;;  %3448 = vmatpush3.bf16.msra.mxu0 %v3447_v13  ;;  %s4406_s1 = sld [smem:[#allocation11_spill]] }
  0x25   : > { %v665_v1 = vld [vmem:[%s661_s29] sm:$0xff]  ;;  %3449 = vmatprep.subr.bf16.mxu0 %v3680_v12  ;;  %s4404_s29 = sld [smem:[#allocation13_spill]]  ;;  %s4374_s26 = smov 72  }
  0x26   : > { %v667_v2 = vadd.f32 %v666_v0, %v665_v1  ;;  %v3083_v21 = vld [vmem:[%s4403_s0] ss:$0 sm:$0xff]  ;;  %s3685_s0 = smov 88  }
  0x28   : > { %v671_v3 = vsel %vm670_vm0, %v667_v2, 0.0  ;;  %3451 = vmatpush3.bf16.msra.mxu0 %v3450_v16 }
  0x29   : > { %672 = vadd.xlane.f32.xlu0 %v671_v3  ;;  %3282 = vmatprep.subr.mxu0 %v3682_v15 }
  0x2a   : > { %s664_s4 = scalar_lea.vmem %s4406_s1, %s3858_s23  ;;  %s4380_s23 = smov 112  }
  0x2b   : > { %v3084_v23 = vld [vmem:[%s4404_s29] ss:$0 sm:$0xff]  ;;  %s4378_s29 = smov 104   ;;  %s4377_s1 = smov 48  }
  0x2c   : > { %v3925_v32 = vld [vmem:[%s664_s4] ss:$0 sm:$0xff]  ;;  %s4375_s4 = smov 56  }
  0xb6   : > { %v673_v4 = vpop.xlane.xlu0 %672 }
  0xb7   : > { %v675_v5 = vmul.f32 0.03125, %v673_v4 }
  0xb9   : > { %v676_v6 = vsub.f32 %v667_v2, %v675_v5 }
  0xbb   : > { %v677_v7 = vmul.f32 %v676_v6, %v676_v6 }
  0xbd   : > { %v678_v8 = vsel %vm670_vm0, %v677_v7, 0.0 }
  0xbe   : > { %679 = vadd.xlane.f32.xlu0 %v678_v8 }
 0x14b   : > { %v680_v17 = vpop.xlane.xlu0 %679 }
 0x14c   : > { %v681_v18 = vmul.f32 0.03125, %v680_v17 }
 0x14e   : > { %v682_v19 = vadd.f32 1e-12, %v681_v18 }
 0x150   : > { %3568 = vrsqrt.f32 %v682_v19 }
 0x15a   : > { %v3569_v20 = vpop.eup %3568 }
 0x15b   : > { %v684_v22 = vmul.f32 %v3569_v20, %v676_v6 }
 0x15d   : > { %v691_v24 = vmul.f32 %v3083_v21, %v684_v22 }
 0x15f   : > { %v3895_v25 = vadd.f32 %v3084_v23, %v691_v24 }
 0x161   : > { %3260 = vmatmul.mubr.msk.f32.vlgmr.msra.gmra.mrb[0].mxu0 %vm670_vm0, %v3895_v25 }
 0x162   : > { %3284 = vmatprep.mubr.msk.f32.mxu0 %vm3681_vm1, %v3682_v15 }
 0x234   : > { %v780_v27 = vpop.f32.mrb[0].mxu0 }
 0x235   : > { %v3904_v28 = vadd.f32 %v3085_v26, %v780_v27  ;;  %v3261_v29 = vpop.f32.mrb[1].mxu0 }
 0x237   : > { %881 = vrot.lane.b32.xlu0 %v3904_v28, %s4373_s22  ;;  %785 = vrot.lane.b32.xlu1 %v3904_v28, %s4382_s24  ;;  %s4379_s22 = smov 80   ;;  %s4408_s24 = smov 96  }
 0x23b   : > { %959 = vrot.lane.b32.xlu0 %v3904_v28, %s3685_s0 }
 0x23f   : > { %957 = vrot.lane.b32.xlu0 %v3904_v28, %s4381_s30  ;;  %s4409_s30 = smov 120  }
 0x2a9   : > { %v786_v30 = vpop.permute.xlu1 %785  ;;  %v882_v31 = vpop.permute.xlu0 %881 }
 0x2aa   : > { %3263 = vmatpush3.xpose.msk.msra.mxu1 %vm787_vm2, %v786_v30 }
 0x2ab   : > { %3267 = vmatprep.subr.mxu1 %v3682_v15 }
 0x2ad   : > { %3265 = vmatmul.mubr.msk.f32.vlgmr.msra.gmra.mrb[0].mxu1 %vm787_vm2, %v3904_v28  ;;  %v960_v44 = vpop.permute.xlu0 %959 }
 0x2ae   : > { %3268 = vmatpush3.msra.mxu1 %v882_v31  ;;  %3269 = vmatprep.mubr.msk.f32.mxu1 %vm3681_vm1, %v3682_v15 }
 0x2af   : > { %3272 = vmatprep.subr.mxu1 %v3682_v15 }
 0x2b1   : > { %v958_v45 = vpop.permute.xlu0 %957 }
 0x380   : > { %v858_v33 = vpop.f32.mrb[0].mxu1 }
 0x381   : > { %v862_v34 = vmul.f32 0.35355338, %v858_v33  ;;  %v3266_v35 = vpop.f32.mrb[1].mxu1 }
 0x383   : > { %v869_v36 = vadd.f32 %v3925_v32, %v862_v34 }
 0x385   : > { %v870_v37 = vsel %vm787_vm2, %v869_v36, -inf }
 0x386   : > { %871 = vmax.xlane.f32.xlu1 %v870_v37  ;;  %v1476_v37 = vld [vmem:[%s4407_s7 + $0x8] sm:$0xff] }
 0x397   : > { %1126 = vrot.lane.b32.xlu1 %v3904_v28, %s4379_s22  ;;  %s4383_s22 = smov 24  }
 0x413   : > { %v872_v38 = vpop.xlane.xlu1 %871 }
 0x414   : > { %v873_v39 = vsub.f32 %v869_v36, %v872_v38  ;;  %v1475_v36 = vld [vmem:[%s4407_s7] sm:$0xff] }
 0x415   : > { %v3453_v38 = vpack.c.bf16 %v1476_v37, %v1475_v36 }
 0x416   : > { %v874_v40 = vmul.f32 1.442695, %v873_v39  ;;  %v1477_v39 = vld [vmem:[%s4407_s7 + $0x10] sm:$0xff] }
 0x417   : > { %v1127_v41 = vpop.permute.xlu1 %1126 }
 0x418   : > { %3570 = vpow2.f32 %v874_v40  ;;  %3283 = vmatpush3.xpose.msk.msra.mxu0 %vm787_vm2, %v1127_v41  ;;  %v1478_v40 = vld [vmem:[%s4407_s7 + $0x18] sm:$0xff] }
 0x419   : > { %3292 = vmatprep.subr.mxu0 %v3682_v15  ;;  %v3456_v41 = vpack.c.bf16 %v1478_v40, %v1477_v39 }
 0x422   : > { %v3571_v42 = vpop.eup %3570 }
 0x423   : > { %v876_v43 = vsel %vm787_vm2, %v3571_v42, 0.0 }
 0x424   : > { %877 = vadd.xlane.f32.xlu0 %v876_v43 }
 0x43a   : > { %1124 = vrot.lane.b32.xlu0 %v3904_v28, %s4380_s23  ;;  %s4410_s23 = smov 112  }
 0x43e   : > { %1293 = vrot.lane.b32.xlu0 %v3904_v28, %s4374_s26  ;;  %s4376_s26 = smov 40  }
 0x442   : > { %1291 = vrot.lane.b32.xlu0 %v3904_v28, %s4378_s29  ;;  %s4384_s29 = smov 16  }
 0x4b1   : > { %v878_v46 = vpop.xlane.xlu0 %877 }
 0x4b2   : > { %3572 = vrcp.f32 %v878_v46 }
 0x4b5   : > { %v1125_v47 = vpop.permute.xlu0 %1124 }
 0x4b6   : > { %3285 = vmatmul.mubr.msk.f32.vlgmr.msra.gmra.mrb[2].mxu0 %vm787_vm2, %v1125_v47 }
 0x4b7   : > { %3294 = vmatprep.mubr.msk.f32.mxu0 %vm3681_vm1, %v3682_v15 }
 0x4b9   : > { %v1294_v48 = vpop.permute.xlu0 %1293 }
 0x4ba   : > { %3293 = vmatpush3.xpose.msk.msra.mxu0 %vm787_vm2, %v1294_v48 }
 0x4bb   : > { %3452 = vmatprep.subr.bf16.mxu0 %v3680_v12 }
 0x4bc   : > { %v3573_v49 = vpop.eup %3572 }
 0x4bd   : > { %v880_v50 = vmul.f32 %v3573_v49, %v3571_v42  ;;  %v1292_v51 = vpop.permute.xlu0 %1291 }
 0x4be   : > { %3295 = vmatmul.mubr.msk.f32.vlgmr.msra.gmra.mrb[4].mxu0 %vm787_vm2, %v1292_v51 }
 0x4bf   : > { %3270 = vmatmul.mubr.msk.f32.vlgmr.msra.gmra.mrb[2].mxu1 %vm787_vm2, %v880_v50  ;;  %3310 = vmatprep.mubr.msk.f32.mxu0 %vm3681_vm1, %v3682_v15 }
 0x4c0   : > { %3273 = vmatpush3.xpose.msk.msra.mxu1 %vm787_vm2, %v960_v44  ;;  %3274 = vmatprep.mubr.msk.f32.mxu1 %vm3681_vm1, %v3682_v15 }
 0x4c1   : > { %3277 = vmatprep.subr.mxu1 %v3682_v15  ;;  %3454 = vmatpush3.bf16.msra.mxu0 %v3453_v38 }
 0x4c2   : > { %3455 = vmatprep.subr.bf16.mxu0 %v3680_v12 }
 0x4c3   : > { %3275 = vmatmul.mubr.msk.f32.vlgmr.msra.gmra.mrb[4].mxu1 %vm787_vm2, %v958_v45 }
 0x4c4   : > { %3279 = vmatprep.mubr.msk.f32.mxu1 %vm3681_vm1, %v3682_v15 }
 0x4c5   : > { %3457 = vmatpush3.bf16.msra.mxu0 %v3456_v41 }
 0x4c6   : > { %3464 = vmatprep.subr.bf16.mxu0 %v3680_v12 }
 0x589   : > { %v1198_v52 = vpop.f32.mrb[2].mxu0 }
 0x58a   : > { %v1202_v53 = vmul.f32 0.35355338, %v1198_v52  ;;  %v3286_v54 = vpop.f32.mrb[3].mxu0 }
 0x58b   : > { %v3100_v54 = vld [vmem:[%s4354_s8] ss:$0 sm:$0xff] }
 0x58c   : > { %v1203_v55 = vadd.f32 %v3925_v32, %v1202_v53 }
 0x58e   : > { %v1204_v56 = vsel %vm787_vm2, %v1203_v55, -inf }
 0x58f   : > { %1205 = vmax.xlane.f32.xlu1 %v1204_v56 }
 0x591   : > { %v1365_v57 = vpop.f32.mrb[4].mxu0 }
 0x592   : > { %v3958_v58 = vpop.f32.mrb[2].mxu1  ;;  %v3296_v59 = vpop.f32.mrb[5].mxu0  ;;  %v1369_v62 = vmul.f32 0.35355338, %v1365_v57 }
 0x593   : > { %v3271_v60 = vpop.f32.mrb[3].mxu1 }
 0x594   : > { %v1370_v3 = vadd.f32 %v3925_v32, %v1369_v62 }
 0x596   : > { %v1031_v61 = vpop.f32.mrb[4].mxu1  ;;  %v1371_v4 = vsel %vm787_vm2, %v1370_v3, -inf }
 0x597   : > { %v1035_v63 = vmul.f32 0.35355338, %v1031_v61  ;;  %v3276_v0 = vpop.f32.mrb[5].mxu1 }
 0x599   : > { %v1036_v1 = vadd.f32 %v3925_v32, %v1035_v63 }
 0x59b   : > { %v1037_v2 = vsel %vm787_vm2, %v1036_v1, -inf }
 0x59c   : > { %1038 = vmax.xlane.f32.xlu0 %v1037_v2  ;;  %v1590_v2 = vld [vmem:[%s4357_s11 + $0x8] sm:$0xff] }
 0x5a0   : > { %1372 = vmax.xlane.f32.xlu0 %v1371_v4  ;;  %v1592_v4 = vld [vmem:[%s4357_s11 + $0x18] sm:$0xff] }
 0x61c   : > { %v1206_v5 = vpop.xlane.xlu1 %1205 }
 0x61d   : > { %v1207_v6 = vsub.f32 %v1203_v55, %v1206_v5 }
 0x61f   : > { %v1208_v7 = vmul.f32 1.442695, %v1207_v6 }
 0x621   : > { %3574 = vpow2.f32 %v1208_v7 }
 0x629   : > { %v1039_v8 = vpop.xlane.xlu0 %1038 }
 0x62a   : > { %v1040_v9 = vsub.f32 %v1036_v1, %v1039_v8  ;;  %v1589_v1 = vld [vmem:[%s4357_s11] sm:$0xff] }
 0x62b   : > { %v3575_v10 = vpop.eup %3574 }
 0x62c   : > { %v1041_v11 = vmul.f32 1.442695, %v1040_v9  ;;  %v1210_v13 = vsel %vm787_vm2, %v3575_v10, 0.0 }
 0x62d   : > { %1211 = vadd.xlane.f32.xlu0 %v1210_v13  ;;  %v1373_v14 = vpop.xlane.xlu0 %1372  ;;  %v3103_v13 = vld [vmem:[%s4356_s10] ss:$0 sm:$0xff] }
 0x62e   : > { %3576 = vpow2.f32 %v1041_v11  ;;  %v1374_v16 = vsub.f32 %v1370_v3, %v1373_v14  ;;  %v3459_v3 = vpack.c.bf16 %v1590_v2, %v1589_v1  ;;  %v3108_v1 = vld [vmem:[%s4361_s15] ss:$0 sm:$0xff] }
 0x630   : > { %v1375_v17 = vmul.f32 1.442695, %v1374_v16 }
 0x632   : > { %3578 = vpow2.f32 %v1375_v17  ;;  %v1682_v17 = vld [vmem:[%s4359_s13] sm:$0xff] }
 0x638   : > { %v3577_v18 = vpop.eup %3576 }
 0x639   : > { %v1043_v19 = vsel %vm787_vm2, %v3577_v18, 0.0 }
 0x63a   : > { %1044 = vadd.xlane.f32.xlu0 %v1043_v19 }
 0x63c   : > { %v3579_v20 = vpop.eup %3578 }
 0x63d   : > { %v1377_v21 = vsel %vm787_vm2, %v3579_v20, 0.0 }
 0x63e   : > { %1378 = vadd.xlane.f32.xlu1 %v1377_v21  ;;  %v1685_v21 = vld [vmem:[%s4359_s13 + $0x18] sm:$0xff] }
 0x64f   : > { %1215 = vrot.lane.b32.xlu1 %v3904_v28, %s4377_s1  ;;  %s4411_s1 = smov 80  }
 0x650   : > { %1048 = vrot.lane.b32.xlu0 %v3904_v28, %s4375_s4  ;;  %s4413_s4 = smov 72  }
 0x653   : > { %1382 = vrot.lane.b32.xlu1 %v3904_v28, %s4376_s26  ;;  %s4385_s26 = smov 8  }
 0x6ba   : > { %v1212_v22 = vpop.xlane.xlu0 %1211 }
 0x6c7   : > { %v1045_v23 = vpop.xlane.xlu0 %1044 }
 0x6c8   : > { %3580 = vrcp.f32 %v1045_v23  ;;  %v1686_v23 = vld [vmem:[%s4359_s13 + $0x20] sm:$0xff] }
 0x6c9   : > { %3582 = vrcp.f32 %v1212_v22 }
 0x6cb   : > { %v1379_v24 = vpop.xlane.xlu1 %1378  ;;  %v1049_v26 = vpop.permute.xlu0 %1048 }
 0x6cc   : > { %3278 = vmatpush3.msra.mxu1 %v1049_v26  ;;  %3584 = vrcp.f32 %v1379_v24  ;;  %v1687_v24 = vld [vmem:[%s4359_s13 + $0x28] sm:$0xff] }
 0x6cd   : > { %3287 = vmatprep.subr.mxu1 %v3682_v15  ;;  %v3471_v26 = vpack.c.bf16 %v1687_v24, %v1686_v23 }
 0x6cf   : > { %v1216_v30 = vpop.permute.xlu1 %1215 }
 0x6d2   : > { %v3581_v27 = vpop.eup %3580 }
 0x6d3   : > { %v1047_v29 = vmul.f32 %v3581_v27, %v3577_v18  ;;  %v3583_v31 = vpop.eup %3582  ;;  %v1383_v34 = vpop.permute.xlu1 %1382  ;;  %v1683_v18 = vld [vmem:[%s4359_s13 + $0x8] sm:$0xff]  ;;  %v1688_v27 = vld [vmem:[%s4359_s13 + $0x30] sm:$0xff] }
 0x6d4   : > { %v1214_v28 = vmul.f32 %v3583_v31, %v3575_v10  ;;  %v3102_v10 = vld [vmem:[%s4355_s9] ss:$0 sm:$0xff]  ;;  %v3465_v19 = vpack.c.bf16 %v1683_v18, %v1682_v17 }
 0x6d5   : > { %3280 = vmatmul.mubr.msk.f32.vlgmr.msra.gmra.mrb[6].mxu1 %vm787_vm2, %v1047_v29  ;;  %v1689_v29 = vld [vmem:[%s4359_s13 + $0x38] sm:$0xff]  ;;  %v3104_v31 = vld [vmem:[%s4358_s12] ss:$0 sm:$0xff] }
 0x6d6   : > { %3288 = vmatpush3.msra.mxu1 %v1216_v30  ;;  %3289 = vmatprep.mubr.msk.f32.mxu1 %vm3681_vm1, %v3682_v15  ;;  %v3585_v33 = vpop.eup %3584  ;;  %v3474_v30 = vpack.c.bf16 %v1689_v29, %v1688_v27 }
 0x6d7   : > { %3297 = vmatprep.subr.mxu1 %v3682_v15  ;;  %v1381_v35 = vmul.f32 %v3585_v33, %v3579_v20  ;;  %v1684_v20 = vld [vmem:[%s4359_s13 + $0x10] sm:$0xff] }
 0x6d8   : > { %v3468_v22 = vpack.c.bf16 %v1685_v21, %v1684_v20 }
 0x6d9   : > { %3290 = vmatmul.mubr.msk.f32.vlgmr.msra.gmra.mrb[8].mxu1 %vm787_vm2, %v1214_v28 }
 0x6da   : > { %3298 = vmatpush3.msra.mxu1 %v1383_v34  ;;  %3299 = vmatprep.mubr.msk.f32.mxu1 %vm3681_vm1, %v3682_v15 }
 0x6db   : > { %3458 = vmatprep.subr.bf16.mxu1 %v3680_v12 }
 0x6dd   : > { %3300 = vmatmul.mubr.msk.f32.vlgmr.msra.gmra.mrb[10].mxu1 %vm787_vm2, %v1381_v35 }
 0x6de   : > { %3321 = vmatprep.mubr.msk.f32.mxu1 %vm3681_vm1, %v3682_v15  ;;  %3460 = vmatpush3.bf16.msra.mxu1 %v3459_v3  ;;  %v3109_v3 = vld [vmem:[%s4362_s16] ss:$0 sm:$0xff] }
 0x6df   : > { %3461 = vmatprep.subr.bf16.mxu1 %v3680_v12 }
 0x7a8   : > { %v1120_v42 = vpop.f32.mrb[6].mxu1 }
 0x7a9   : > { %1459 = vrot.lane.b32.xlu1 %v1120_v42, %s4385_s26  ;;  %v3281_v43 = vpop.f32.mrb[7].mxu1  ;;  %s4415_s26 = smov 48  }
 0x7ac   : > { %v1287_v44 = vpop.f32.mrb[8].mxu1 }
 0x7ad   : > { %1463 = vrot.lane.b32.xlu0 %v1287_v44, %s4384_s29  ;;  %v3291_v45 = vpop.f32.mrb[9].mxu1  ;;  %v3106_v44 = vld [vmem:[%s4360_s14] ss:$0 sm:$0xff]  ;;  %s4416_s29 = smov 40  }
 0x7b0   : > { %v1454_v46 = vpop.f32.mrb[10].mxu1 }
 0x7b1   : > { %1467 = vrot.lane.b32.xlu1 %v1454_v46, %s4383_s22  ;;  %v3301_v47 = vpop.f32.mrb[11].mxu1  ;;  %s4412_s22 = smov 104  }
 0x81b   : > { %v1460_v48 = vpop.permute.xlu1 %1459 }
 0x81c   : > { %v1470_v50 = vsel %vm787_vm2, %v3958_v58, %v1460_v48 }
 0x81f   : > { %v1464_v49 = vpop.permute.xlu0 %1463 }
 0x820   : > { %v1472_v51 = vsel %vm1471_vm3, %v1470_v50, %v1464_v49 }
 0x823   : > { %v1468_v52 = vpop.permute.xlu1 %1467 }
 0x824   : > { %v1474_v53 = vsel %vm1473_vm4, %v1472_v51, %v1468_v52 }
 0x825   : > { %3311 = vmatmul.mubr.msk.f32.vlgmr.msra.gmra.mrb[6].mxu0 %vm670_vm0, %v1474_v53 }
 0x826   : > { %3340 = vmatprep.mubr.msk.f32.mxu0 %vm3681_vm1, %v3682_v15  ;;  %3466 = vmatpush3.bf16.msra.mxu0 %v3465_v19 }
 0x827   : > { %3467 = vmatprep.subr.bf16.mxu0 %v3680_v12 }
 0x82a   : > { %3469 = vmatpush3.bf16.msra.mxu0 %v3468_v22 }
 0x82b   : > { %3470 = vmatprep.subr.bf16.mxu0 %v3680_v12 }
 0x82e   : > { %3472 = vmatpush3.bf16.msra.mxu0 %v3471_v26 }
 0x82f   : > { %3473 = vmatprep.subr.bf16.mxu0 %v3680_v12 }
 0x832   : > { %3475 = vmatpush3.bf16.msra.mxu0 %v3474_v30 }
 0x833   : > { %3364 = vmatprep.subr.mxu0 %v3682_v15 }
 0x8f8   : > { %v1555_v55 = vpop.f32.mrb[6].mxu0 }
 0x8f9   : > { %v1556_v56 = vadd.f32 %v3100_v54, %v1555_v55  ;;  %v3312_v57 = vpop.f32.mrb[7].mxu0  ;;  %v3110_v55 = vld [vmem:[%s4402_s28 + $0x20] sm:$0xff] }
 0x8fb   : > { %v1559_v59 = vadd.f32 %v1556_v56, %v3895_v25  ;;  %v1591_v25 = vld [vmem:[%s4357_s11 + $0x10] sm:$0xff]  ;;  %v3111_v56 = vld [vmem:[%s4402_s28 + $0x28] sm:$0xff] }
 0x8fc   : > { %v3462_v5 = vpack.c.bf16 %v1592_v4, %v1591_v25  ;;  %v3477_v57 = vpack.c.bf16 %v3111_v56, %v3110_v55 }
 0x8fd   : > { %v1562_v58 = vsel %vm670_vm0, %v1559_v59, 0.0 }
 0x8fe   : > { %1563 = vadd.xlane.f32.xlu0 %v1562_v58  ;;  %3463 = vmatpush3.bf16.msra.mxu1 %v3462_v5  ;;  %v3113_v58 = vld [vmem:[%s4402_s28 + $0x38] sm:$0xff]  ;;  %v3115_v5 = vld [vmem:[%s4405_s6 + $0x1] ss:$0 sm:$0xff] }
 0x8ff   : > { %3476 = vmatprep.subr.bf16.mxu1 %v3680_v12 }
 0x98b   : > { %v1564_v60 = vpop.xlane.xlu0 %1563 }
 0x98c   : > { %v1565_v61 = vmul.f32 0.03125, %v1564_v60 }
 0x98e   : > { %v1566_v62 = vsub.f32 %v1559_v59, %v1565_v61  ;;  %v3112_v59 = vld [vmem:[%s4402_s28 + $0x30] sm:$0xff] }
 0x98f   : > { %v3480_v60 = vpack.c.bf16 %v3113_v58, %v3112_v59 }
 0x990   : > { %v1567_v63 = vmul.f32 %v1566_v62, %v1566_v62 }
 0x992   : > { %v1568_v0 = vsel %vm670_vm0, %v1567_v63, 0.0 }
 0x993   : > { %1569 = vadd.xlane.f32.xlu1 %v1568_v0 }
 0xa20   : > { %v1570_v6 = vpop.xlane.xlu1 %1569 }
 0xa21   : > { %v1571_v7 = vmul.f32 0.03125, %v1570_v6 }
 0xa23   : > { %v1572_v8 = vadd.f32 1e-12, %v1571_v7 }
 0xa25   : > { %3586 = vrsqrt.f32 %v1572_v8 }
 0xa2f   : > { %v3587_v9 = vpop.eup %3586 }
 0xa30   : > { %v1574_v11 = vmul.f32 %v3587_v9, %v1566_v62 }
 0xa32   : > { %v1581_v14 = vmul.f32 %v3102_v10, %v1574_v11 }
 0xa34   : > { %v1588_v16 = vadd.f32 %v3103_v13, %v1581_v14 }
 0xa36   : > { %3322 = vmatmul.mubr.msk.f32.vlgmr.msra.gmra.mrb[12].mxu1 %vm670_vm0, %v1588_v16 }
 0xa37   : > { %3351 = vmatprep.mubr.msk.f32.mxu1 %vm3681_vm1, %v3682_v15  ;;  %3478 = vmatpush3.bf16.msra.mxu1 %v3477_v57 }
 0xa38   : > { %3479 = vmatprep.subr.bf16.mxu1 %v3680_v12 }
 0xa3b   : > { %3481 = vmatpush3.bf16.msra.mxu1 %v3480_v60 }
 0xa3c   : > { %3354 = vmatprep.subr.mxu1 %v3682_v15 }
 0xb09   : > { %v1669_v28 = vpop.f32.mrb[12].mxu1 }
 0xb0a   : > { %v1670_v33 = vadd.f32 %v3104_v31, %v1669_v28  ;;  %v3323_v34 = vpop.f32.mrb[13].mxu1 }
 0xb0c   : > { %v1673_v35 = vmul.f32 %v1670_v33, %v1670_v33 }
 0xb0e   : > { %v1674_v36 = vmul.f32 %v1673_v35, %v1670_v33 }
 0xb10   : > { %v1675_v37 = vmul.f32 0.044715, %v1674_v36 }
 0xb12   : > { %v1676_v38 = vadd.f32 %v1675_v37, %v1670_v33 }
 0xb14   : > { %v1677_v39 = vmul.f32 0.7978846, %v1676_v38 }
 0xb16   : > { %3588 = vtanh.f32 %v1677_v39 }
 0xb20   : > { %v3589_v40 = vpop.eup %3588 }
 0xb21   : > { %v1679_v41 = vadd.f32 1.0, %v3589_v40 }
 0xb23   : > { %v1680_v42 = vmul.f32 0.5, %v1679_v41 }
 0xb25   : > { %v1681_v43 = vmul.f32 %v1680_v42, %v1670_v33 }
 0xb27   : > { %3341 = vmatmul.mubr.msk.f32.vlgmr.msra.gmra.mrb[8].mxu0 %vm1697_vm5, %v1681_v43 }
 0xb28   : > { %3366 = vmatprep.mubr.msk.f32.mxu0 %vm3681_vm1, %v3682_v15 }
 0xbfa   : > { %v1767_v45 = vpop.f32.mrb[8].mxu0 }
 0xbfb   : > { %v1768_v46 = vadd.f32 %v3106_v44, %v1767_v45  ;;  %v3342_v47 = vpop.f32.mrb[9].mxu0 }
 0xbfd   : > { %v1771_v48 = vadd.f32 %v1768_v46, %v1588_v16 }
 0xbff   : > { %v1774_v49 = vsel %vm670_vm0, %v1771_v48, 0.0 }
 0xc00   : > { %1775 = vadd.xlane.f32.xlu0 %v1774_v49 }
 0xc8d   : > { %v1776_v50 = vpop.xlane.xlu0 %1775 }
 0xc8e   : > { %v1777_v51 = vmul.f32 0.03125, %v1776_v50 }
 0xc90   : > { %v1778_v52 = vsub.f32 %v1771_v48, %v1777_v51 }
 0xc92   : > { %v1779_v53 = vmul.f32 %v1778_v52, %v1778_v52 }
 0xc94   : > { %v1780_v54 = vsel %vm670_vm0, %v1779_v53, 0.0 }
 0xc95   : > { %1781 = vadd.xlane.f32.xlu0 %v1780_v54 }
 0xd22   : > { %v1782_v61 = vpop.xlane.xlu0 %1781 }
 0xd23   : > { %v1783_v62 = vmul.f32 0.03125, %v1782_v61 }
 0xd25   : > { %v1784_v63 = vadd.f32 1e-12, %v1783_v62 }
 0xd27   : > { %3590 = vrsqrt.f32 %v1784_v63 }
 0xd31   : > { %v3591_v0 = vpop.eup %3590 }
 0xd32   : > { %v1786_v2 = vmul.f32 %v3591_v0, %v1778_v52 }
 0xd34   : > { %v1793_v25 = vmul.f32 %v3108_v1, %v1786_v2 }
 0xd36   : > { %v4097_v4 = vadd.f32 %v3109_v3, %v1793_v25 }
 0xd38   : > { %3352 = vmatmul.mubr.msk.f32.vlgmr.msra.gmra.mrb[14].mxu1 %vm670_vm0, %v4097_v4 }
 0xd39   : > { %3356 = vmatprep.mubr.msk.f32.mxu1 %vm3681_vm1, %v3682_v15 }
 0xe0b   : > { %v1883_v6 = vpop.f32.mrb[14].mxu1 }
 0xe0c   : > { %v4106_v7 = vadd.f32 %v3115_v5, %v1883_v6  ;;  %v3353_v8 = vpop.f32.mrb[15].mxu1 }
 0xe0e   : > { %2055 = vrot.lane.b32.xlu1 %v4106_v7, %s3685_s0  ;;  %1888 = vrot.lane.b32.xlu0 %v4106_v7, %s4408_s24  ;;  %s4414_s0 = smov 64   ;;  %s4417_s24 = smov 56  }
 0xe12   : > { %2053 = vrot.lane.b32.xlu1 %v4106_v7, %s4409_s30  ;;  %2220 = vrot.lane.b32.xlu0 %v4106_v7, %s4410_s23  ;;  %s4419_s30 = smov 16   ;;  %s4420_s23 = smov 24  }
 0xe16   : > { %2222 = vrot.lane.b32.xlu1 %v4106_v7, %s4411_s1  ;;  %2387 = vrot.lane.b32.xlu0 %v4106_v7, %s4412_s22 }
 0xe1a   : > { %2389 = vrot.lane.b32.xlu1 %v4106_v7, %s4413_s4 }
 0xe80   : > { %v2056_v9 = vpop.permute.xlu1 %2055  ;;  %v1889_v10 = vpop.permute.xlu0 %1888 }
 0xe81   : > { %3355 = vmatpush3.xpose.msk.msra.mxu1 %vm787_vm2, %v1889_v10  ;;  %3365 = vmatpush3.xpose.msk.msra.mxu0 %vm787_vm2, %v2056_v9 }
 0xe82   : > { %3374 = vmatprep.subr.mxu0 %v3682_v15  ;;  %3359 = vmatprep.subr.mxu1 %v3682_v15 }
 0xe84   : > { %v2054_v11 = vpop.permute.xlu1 %2053  ;;  %3357 = vmatmul.mubr.msk.f32.vlgmr.msra.gmra.mrb[16].mxu1 %vm787_vm2, %v4106_v7  ;;  %v2221_v14 = vpop.permute.xlu0 %2220 }
 0xe85   : > { %3367 = vmatmul.mubr.msk.f32.vlgmr.msra.gmra.mrb[10].mxu0 %vm787_vm2, %v2054_v11  ;;  %3361 = vmatprep.mubr.msk.f32.mxu1 %vm3681_vm1, %v3682_v15  ;;  %v3129_v11 = vld [vmem:[%s4407_s7 + $0x20] sm:$0xff] }
 0xe86   : > { %3376 = vmatprep.mubr.msk.f32.mxu0 %vm3681_vm1, %v3682_v15 }
 0xe88   : > { %v2223_v13 = vpop.permute.xlu1 %2222  ;;  %v2388_v17 = vpop.permute.xlu0 %2387 }
 0xe89   : > { %3375 = vmatpush3.xpose.msk.msra.mxu0 %vm787_vm2, %v2223_v13  ;;  %v3130_v13 = vld [vmem:[%s4407_s7 + $0x28] sm:$0xff] }
 0xe8a   : > { %3384 = vmatprep.subr.mxu0 %v3682_v15 }
 0xe8c   : > { %v2390_v16 = vpop.permute.xlu1 %2389  ;;  %3377 = vmatmul.mubr.msk.f32.vlgmr.msra.gmra.mrb[12].mxu0 %vm787_vm2, %v2221_v14  ;;  %v3483_v14 = vpack.c.bf16 %v3130_v13, %v3129_v11 }
 0xe8d   : > { %3385 = vmatpush3.xpose.msk.msra.mxu0 %vm787_vm2, %v2390_v16  ;;  %3386 = vmatprep.mubr.msk.f32.mxu0 %vm3681_vm1, %v3682_v15  ;;  %v3131_v16 = vld [vmem:[%s4407_s7 + $0x30] sm:$0xff] }
 0xe8e   : > { %3482 = vmatprep.subr.bf16.mxu0 %v3680_v12 }
 0xe90   : > { %3387 = vmatmul.mubr.msk.f32.vlgmr.msra.gmra.mrb[14].mxu0 %vm787_vm2, %v2388_v17  ;;  %v3132_v17 = vld [vmem:[%s4407_s7 + $0x38] sm:$0xff] }
 0xe91   : > { %3402 = vmatprep.mubr.msk.f32.mxu0 %vm3681_vm1, %v3682_v15  ;;  %3484 = vmatpush3.bf16.msra.mxu0 %v3483_v14 }
 0xe92   : > { %3485 = vmatprep.subr.bf16.mxu0 %v3680_v12 }
 0xf57   : > { %v1960_v18 = vpop.f32.mrb[16].mxu1 }
 0xf58   : > { %v1964_v19 = vmul.f32 0.35355338, %v1960_v18  ;;  %v3358_v20 = vpop.f32.mrb[17].mxu1  ;;  %v2127_v21 = vpop.f32.mrb[10].mxu0  ;;  %v3486_v18 = vpack.c.bf16 %v3132_v17, %v3131_v16 }
 0xf59   : > { %v2131_v22 = vmul.f32 0.35355338, %v2127_v21  ;;  %v3368_v23 = vpop.f32.mrb[11].mxu0 }
 0xf5a   : > { %v1965_v24 = vadd.f32 %v3925_v32, %v1964_v19  ;;  %3487 = vmatpush3.bf16.msra.mxu0 %v3486_v18 }
 0xf5b   : > { %v2132_v26 = vadd.f32 %v3925_v32, %v2131_v22  ;;  %3494 = vmatprep.subr.bf16.mxu0 %v3680_v12 }
 0xf5c   : > { %v1966_v27 = vsel %vm787_vm2, %v1965_v24, -inf }
 0xf5d   : > { %1967 = vmax.xlane.f32.xlu1 %v1966_v27  ;;  %v2133_v29 = vsel %vm787_vm2, %v2132_v26, -inf }
 0xf5e   : > { %2134 = vmax.xlane.f32.xlu0 %v2133_v29 }
 0xf5f   : > { %v2294_v30 = vpop.f32.mrb[12].mxu0 }
 0xf60   : > { %v2298_v31 = vmul.f32 0.35355338, %v2294_v30  ;;  %v3378_v28 = vpop.f32.mrb[13].mxu0 }
 0xf62   : > { %v2299_v33 = vadd.f32 %v3925_v32, %v2298_v31 }
 0xf63   : > { %v2461_v34 = vpop.f32.mrb[14].mxu0 }
 0xf64   : > { %v2465_v35 = vmul.f32 0.35355338, %v2461_v34  ;;  %v3388_v36 = vpop.f32.mrb[15].mxu0  ;;  %v2300_v37 = vsel %vm787_vm2, %v2299_v33, -inf }
 0xf65   : > { %2301 = vmax.xlane.f32.xlu0 %v2300_v37 }
 0xf66   : > { %v2466_v38 = vadd.f32 %v3925_v32, %v2465_v35  ;;  %v3134_v35 = vld [vmem:[%s4354_s8 + $0x1] ss:$0 sm:$0xff] }
 0xf68   : > { %v2467_v39 = vsel %vm787_vm2, %v2466_v38, -inf }
 0xf69   : > { %2468 = vmax.xlane.f32.xlu0 %v2467_v39 }
 0xf6e   : > { %1977 = vrot.lane.b32.xlu1 %v4106_v7, %s4414_s0  ;;  %s656_s0 = sand.u32 1, %s3670_s25  }
 0xf6f   : > { %s657_s1 = scalar_lea.vmem [#allocation2], %s656_s0 }
 0xf70   : > { %s3014_s22 = sshll.u32 %s657_s1, 4  ;;  %s4305_s22 = int_to_ptr.vmem [resolvable:$true] %s3014_s22 }
 0xfea   : > { %v1968_v40 = vpop.xlane.xlu1 %1967 }
 0xfeb   : > { %v1969_v41 = vsub.f32 %v1965_v24, %v1968_v40  ;;  %v2135_v42 = vpop.xlane.xlu0 %2134 }
 0xfec   : > { %v2136_v43 = vsub.f32 %v2132_v26, %v2135_v42 }
 0xfed   : > { %v1970_v44 = vmul.f32 1.442695, %v1969_v41 }
 0xfee   : > { %v2137_v45 = vmul.f32 1.442695, %v2136_v43  ;;  %v1978_v46 = vpop.permute.xlu1 %1977 }
 0xfef   : > { %3592 = vpow2.f32 %v1970_v44  ;;  %3360 = vmatpush3.msra.mxu1 %v1978_v46  ;;  %v3140_v46 = vld [vmem:[%s4357_s11 + $0x20] sm:$0xff] }
 0xff0   : > { %3594 = vpow2.f32 %v2137_v45  ;;  %3369 = vmatprep.subr.mxu1 %v3682_v15 }
 0xff2   : > { %v2302_v47 = vpop.xlane.xlu0 %2301 }
 0xff3   : > { %v2303_v32 = vsub.f32 %v2299_v33, %v2302_v47  ;;  %v3141_v47 = vld [vmem:[%s4357_s11 + $0x28] sm:$0xff] }
 0xff5   : > { %v2304_v48 = vmul.f32 1.442695, %v2303_v32  ;;  %v3489_v32 = vpack.c.bf16 %v3141_v47, %v3140_v46  ;;  %v3161_v46 = vld [vmem:[%s4362_s16 + $0x1] ss:$0 sm:$0xff] }
 0xff6   : > { %v2469_v49 = vpop.xlane.xlu0 %2468 }
 0xff7   : > { %3596 = vpow2.f32 %v2304_v48  ;;  %v2470_v50 = vsub.f32 %v2466_v38, %v2469_v49  ;;  %v3143_v48 = vld [vmem:[%s4357_s11 + $0x38] sm:$0xff] }
 0xff9   : > { %v3593_v51 = vpop.eup %3592  ;;  %v2471_v52 = vmul.f32 1.442695, %v2470_v50 }
 0xffa   : > { %v3595_v53 = vpop.eup %3594  ;;  %v1972_v54 = vsel %vm787_vm2, %v3593_v51, 0.0 }
 0xffb   : > { %3598 = vpow2.f32 %v2471_v52  ;;  %1973 = vadd.xlane.f32.xlu1 %v1972_v54  ;;  %v2139_v55 = vsel %vm787_vm2, %v3595_v53, 0.0  ;;  %v3138_v54 = vld [vmem:[%s4355_s9 + $0x1] ss:$0 sm:$0xff] }
 0xffc   : > { %2140 = vadd.xlane.f32.xlu0 %v2139_v55 }
0x1001   : > { %v3597_v56 = vpop.eup %3596 }
0x1002   : > { %v2306_v57 = vsel %vm787_vm2, %v3597_v56, 0.0 }
0x1003   : > { %2307 = vadd.xlane.f32.xlu1 %v2306_v57 }
0x1005   : > { %v3599_v59 = vpop.eup %3598 }
0x1006   : > { %v2473_v58 = vsel %vm787_vm2, %v3599_v59, 0.0 }
0x1007   : > { %2474 = vadd.xlane.f32.xlu0 %v2473_v58  ;;  %v3147_v58 = vld [vmem:[%s4359_s13 + $0x40] sm:$0xff] }
0x1014   : > { %2311 = vrot.lane.b32.xlu1 %v4106_v7, %s4415_s26  ;;  %s3002_s26 = scalar_lea.sflag [#allocation3], %s656_s0 }
0x1018   : > { %2478 = vrot.lane.b32.xlu1 %v4106_v7, %s4416_s29  ;;  %s3616_s29 = scalar_lea.vmem %s4305_s22, 16 }
0x1019   : > { %p3617_p11 = scmp.ne.s32.totalorder %s4305_s22, %s3616_s29 }
0x101b   : > { %p3618_p12 = pnand %p3617_p11, %p3846_p5 }
0x101d   : > { %2144 = vrot.lane.b32.xlu0 %v4106_v7, %s4417_s24  ;;  %s4418_s24 = smov 8   ;;  %p3619_p13 = pneg %p3618_p12 }
0x1088   : > { %v1974_v60 = vpop.xlane.xlu1 %1973 }
0x1089   : > { %3600 = vrcp.f32 %v1974_v60  ;;  %v2141_v61 = vpop.xlane.xlu0 %2140  ;;  %v3148_v60 = vld [vmem:[%s4359_s13 + $0x48] sm:$0xff] }
0x108a   : > { %3602 = vrcp.f32 %v2141_v61  ;;  %v3495_v61 = vpack.c.bf16 %v3148_v60, %v3147_v58  ;;  %v2982_v60 = vld [vmem:[%s4365_s19] sm:$0x1] }
0x1090   : > { %v2308_v62 = vpop.xlane.xlu1 %2307 }
0x1091   : > { %3604 = vrcp.f32 %v2308_v62  ;;  %v3149_v62 = vld [vmem:[%s4359_s13 + $0x50] sm:$0xff] }
0x1093   : > { %v3601_v63 = vpop.eup %3600 }
0x1094   : > { %v1976_v0 = vmul.f32 %v3601_v63, %v3593_v51  ;;  %v2475_v1 = vpop.xlane.xlu0 %2474  ;;  %v3603_v2 = vpop.eup %3602 }
0x1095   : > { %3606 = vrcp.f32 %v2475_v1  ;;  %v2143_v3 = vmul.f32 %v3603_v2, %v3595_v53  ;;  %v2312_v25 = vpop.permute.xlu1 %2311  ;;  %v3152_v1 = vld [vmem:[%s4359_s13 + $0x68] sm:$0xff] }
0x1096   : > { %3362 = vmatmul.mubr.msk.f32.vlgmr.msra.gmra.mrb[18].mxu1 %vm787_vm2, %v1976_v0  ;;  %v3151_v0 = vld [vmem:[%s4359_s13 + $0x60] sm:$0xff] }
0x1097   : > { %3371 = vmatprep.mubr.msk.f32.mxu1 %vm3681_vm1, %v3682_v15  ;;  %v3501_v2 = vpack.c.bf16 %v3152_v1, %v3151_v0 }
0x1098   : > { %v2145_v5 = vpop.permute.xlu0 %2144 }
0x1099   : > { %3370 = vmatpush3.msra.mxu1 %v2145_v5  ;;  %v2479_v8 = vpop.permute.xlu1 %2478 }
0x109a   : > { %3372 = vmatmul.mubr.msk.f32.vlgmr.msra.gmra.mrb[20].mxu1 %vm787_vm2, %v2143_v3  ;;  %3379 = vmatprep.subr.mxu1 %v3682_v15  ;;  %v3153_v3 = vld [vmem:[%s4359_s13 + $0x70] sm:$0xff] }
0x109b   : > { %v3605_v6 = vpop.eup %3604  ;;  %3380 = vmatpush3.msra.mxu1 %v2312_v25  ;;  %3381 = vmatprep.mubr.msk.f32.mxu1 %vm3681_vm1, %v3682_v15  ;;  %v3154_v25 = vld [vmem:[%s4359_s13 + $0x78] sm:$0xff] }
0x109c   : > { %v2310_v7 = vmul.f32 %v3605_v6, %v3597_v56  ;;  %3389 = vmatprep.subr.mxu1 %v3682_v15  ;;  %v3139_v56 = vld [vmem:[%s4356_s10 + $0x1] ss:$0 sm:$0xff]  ;;  %v3504_v5 = vpack.c.bf16 %v3154_v25, %v3153_v3 }
0x109d   : > { %v3145_v6 = vld [vmem:[%s4358_s12 + $0x1] ss:$0 sm:$0xff] }
0x109e   : > { %3382 = vmatmul.mubr.msk.f32.vlgmr.msra.gmra.mrb[22].mxu1 %vm787_vm2, %v2310_v7 }
0x109f   : > { %v3607_v9 = vpop.eup %3606  ;;  %3390 = vmatpush3.msra.mxu1 %v2479_v8  ;;  %3391 = vmatprep.mubr.msk.f32.mxu1 %vm3681_vm1, %v3682_v15 }
0x10a0   : > { %v2477_v10 = vmul.f32 %v3607_v9, %v3599_v59  ;;  %3488 = vmatprep.subr.bf16.mxu1 %v3680_v12 }
0x10a2   : > { %3392 = vmatmul.mubr.msk.f32.vlgmr.msra.gmra.mrb[24].mxu1 %vm787_vm2, %v2477_v10 }
0x10a3   : > { %3413 = vmatprep.mubr.msk.f32.mxu1 %vm3681_vm1, %v3682_v15  ;;  %3490 = vmatpush3.bf16.msra.mxu1 %v3489_v32 }
0x10a4   : > { %3491 = vmatprep.subr.bf16.mxu1 %v3680_v12 }
0x1169   : > { %v2049_v19 = vpop.f32.mrb[18].mxu1 }
0x116a   : > { %v3363_v20 = vpop.f32.mrb[19].mxu1 }
0x116d   : > { %v2216_v21 = vpop.f32.mrb[20].mxu1 }
0x116e   : > { %2555 = vrot.lane.b32.xlu1 %v2216_v21, %s4418_s24  ;;  %v3373_v22 = vpop.f32.mrb[21].mxu1  ;;  %v3156_v21 = vld [vmem:[%s4360_s14 + $0x1] ss:$0 sm:$0xff] }
0x1171   : > { %v2383_v23 = vpop.f32.mrb[22].mxu1 }
0x1172   : > { %2559 = vrot.lane.b32.xlu0 %v2383_v23, %s4419_s30  ;;  %v3383_v24 = vpop.f32.mrb[23].mxu1 }
0x1175   : > { %v2550_v26 = vpop.f32.mrb[24].mxu1 }
0x1176   : > { %2563 = vrot.lane.b32.xlu1 %v2550_v26, %s4420_s23  ;;  %v3393_v27 = vpop.f32.mrb[25].mxu1  ;;  %s3163_s23 = sshll.u32 %s3829_s3, 4  ;;  %s3697_s3 = smov [#allocation2]  }
0x1177   : > { %s4303_s7 = scalar_lea.hbm %s4367_s21, %s3163_s23  ;;  %s3620_s24 = sshll.u32 %s3697_s3, 4  ;;  %s3621_s24 = int_to_ptr.vmem [resolvable:$false] %s3620_s24 }
0x1178   : > { %s3622_s30 = scalar_lea.vmem %s3621_s24, 32  ;;  %p3623_p0 = scmp.lt.s32.totalorder %s4305_s22, %s3621_s24 }
0x1179   : > { %p3624_p1 = scmp.lt.s32.totalorder %s3622_s30, %s3616_s29 }
0x117b   : > { %p3625_p2 = por %p3624_p1, %p3623_p0 }
0x117d   : > { %p3626_p3 = pnand %p3625_p2, %p3619_p13 }
0x11e0   : > { %v2556_v29 = vpop.permute.xlu1 %2555 }
0x11e1   : > { %v2566_v31 = vsel %vm787_vm2, %v2049_v19, %v2556_v29 }
0x11e4   : > { %v2560_v30 = vpop.permute.xlu0 %2559 }
0x11e5   : > { %v2567_v28 = vsel %vm1471_vm3, %v2566_v31, %v2560_v30 }
0x11e8   : > { %v2564_v33 = vpop.permute.xlu1 %2563 }
0x11e9   : > { %v2568_v34 = vsel %vm1473_vm4, %v2567_v28, %v2564_v33 }
0x11ea   : > { %3403 = vmatmul.mubr.msk.f32.vlgmr.msra.gmra.mrb[16].mxu0 %vm670_vm0, %v2568_v34  ;;  %v2904_v34 = vld [vmem:[%s4363_s17] sm:$0xff] }
0x11eb   : > { %3432 = vmatprep.mubr.msk.f32.mxu0 %vm3681_vm1, %v3682_v15  ;;  %3496 = vmatpush3.bf16.msra.mxu0 %v3495_v61 }
0x11ec   : > { %3497 = vmatprep.subr.bf16.mxu0 %v3680_v12 }
0x12bd   : > { %v2651_v36 = vpop.f32.mrb[16].mxu0 }
0x12be   : > { %v2652_v37 = vadd.f32 %v3134_v35, %v2651_v36  ;;  %v3404_v38 = vpop.f32.mrb[17].mxu0  ;;  %v2905_v35 = vld [vmem:[%s4363_s17 + $0x8] sm:$0xff] }
0x12bf   : > { %v3507_v36 = vpack.c.bf16 %v2905_v35, %v2904_v34  ;;  %v2907_v38 = vld [vmem:[%s4363_s17 + $0x18] sm:$0xff] }
0x12c0   : > { %v2655_v39 = vadd.f32 %v2652_v37, %v4097_v4  ;;  %v3142_v4 = vld [vmem:[%s4357_s11 + $0x30] sm:$0xff] }
0x12c1   : > { %v3492_v49 = vpack.c.bf16 %v3143_v48, %v3142_v4  ;;  %v2906_v37 = vld [vmem:[%s4363_s17 + $0x10] sm:$0xff] }
0x12c2   : > { %v2660_v40 = vsel %vm670_vm0, %v2655_v39, 0.0 }
0x12c3   : > { %2661 = vadd.xlane.f32.xlu0 %v2660_v40  ;;  %3493 = vmatpush3.bf16.msra.mxu1 %v3492_v49 }
0x12c4   : > { %3506 = vmatprep.subr.bf16.mxu1 %v3680_v12 }
0x1350   : > { %v2662_v41 = vpop.xlane.xlu0 %2661 }
0x1351   : > { %v2663_v42 = vmul.f32 0.03125, %v2662_v41 }
0x1353   : > { %v2664_v43 = vsub.f32 %v2655_v39, %v2663_v42  ;;  %v3510_v39 = vpack.c.bf16 %v2907_v38, %v2906_v37 }
0x1355   : > { %v2665_v44 = vmul.f32 %v2664_v43, %v2664_v43 }
0x1357   : > { %v2666_v45 = vsel %vm670_vm0, %v2665_v44, 0.0  ;;  %v3160_v44 = vld [vmem:[%s4361_s15 + $0x1] ss:$0 sm:$0xff] }
0x1358   : > { %2667 = vadd.xlane.f32.xlu1 %v2666_v45 }
0x13e5   : > { %v2668_v50 = vpop.xlane.xlu1 %2667 }
0x13e6   : > { %v2669_v51 = vmul.f32 0.03125, %v2668_v50 }
0x13e8   : > { %v2670_v52 = vadd.f32 1e-12, %v2669_v51 }
0x13ea   : > { %3608 = vrsqrt.f32 %v2670_v52 }
0x13f4   : > { %v3609_v53 = vpop.eup %3608 }
0x13f5   : > { %v2672_v55 = vmul.f32 %v3609_v53, %v2664_v43 }
0x13f7   : > { %v2679_v57 = vmul.f32 %v3138_v54, %v2672_v55 }
0x13f9   : > { %v2686_v59 = vadd.f32 %v3139_v56, %v2679_v57 }
0x13fb   : > { %3414 = vmatmul.mubr.msk.f32.vlgmr.msra.gmra.mrb[26].mxu1 %vm670_vm0, %v2686_v59 }
0x13fc   : > { %3443 = vmatprep.mubr.msk.f32.mxu1 %vm3681_vm1, %v3682_v15  ;;  %v3150_v15 = vld [vmem:[%s4359_s13 + $0x58] sm:$0xff]  ;;  %3508 = vmatpush3.bf16.msra.mxu1 %v3507_v36 }
0x13fd   : > { %v3498_v63 = vpack.c.bf16 %v3150_v15, %v3149_v62  ;;  %3509 = vmatprep.subr.bf16.mxu1 %v3680_v12  ;;  %v2983_v62 = vld [vmem:[%s4366_s20] sm:$0x1] }
0x13ff   : > { %3499 = vmatpush3.bf16.msra.mxu0 %v3498_v63 }
0x1400   : > { %3500 = vmatprep.subr.bf16.mxu0 %v3680_v12  ;;  %3511 = vmatpush3.bf16.msra.mxu1 %v3510_v39 }
0x1403   : > { %3502 = vmatpush3.bf16.msra.mxu0 %v3501_v2 }
0x1404   : > { %3503 = vmatprep.subr.bf16.mxu0 %v3680_v12  ;;  %v2908_v12 = vld [vmem:[%s4364_s18] sm:$0x1] }
0x1407   : > { %3505 = vmatpush3.bf16.msra.mxu0 %v3504_v5 }
0x14ce   : > { %v2769_v7 = vpop.f32.mrb[26].mxu1 }
0x14cf   : > { %v2770_v8 = vadd.f32 %v3145_v6, %v2769_v7  ;;  %v3415_v9 = vpop.f32.mrb[27].mxu1 }
0x14d1   : > { %v2773_v10 = vmul.f32 %v2770_v8, %v2770_v8 }
0x14d3   : > { %v2774_v11 = vmul.f32 %v2773_v10, %v2770_v8 }
0x14d5   : > { %v2775_v13 = vmul.f32 0.044715, %v2774_v11 }
0x14d7   : > { %v2776_v14 = vadd.f32 %v2775_v13, %v2770_v8 }
0x14d9   : > { %v2777_v16 = vmul.f32 0.7978846, %v2776_v14 }
0x14db   : > { %3610 = vtanh.f32 %v2777_v16 }
0x14e5   : > { %v3611_v17 = vpop.eup %3610 }
0x14e6   : > { %v2779_v18 = vadd.f32 1.0, %v3611_v17 }
0x14e8   : > { %v2780_v19 = vmul.f32 0.5, %v2779_v18 }
0x14ea   : > { %v2781_v20 = vmul.f32 %v2780_v19, %v2770_v8 }
0x14ec   : > { %3433 = vmatmul.mubr.msk.f32.vlgmr.msra.gmra.mrb[18].mxu0 %vm1697_vm5, %v2781_v20 }
0x15bf   : > { %v2868_v22 = vpop.f32.mrb[18].mxu0 }
0x15c0   : > { %v2869_v23 = vadd.f32 %v3156_v21, %v2868_v22  ;;  %v3434_v24 = vpop.f32.mrb[19].mxu0 }
0x15c2   : > { %v2872_v26 = vadd.f32 %v2869_v23, %v2686_v59 }
0x15c4   : > { %v2877_v27 = vsel %vm670_vm0, %v2872_v26, 0.0 }
0x15c5   : > { %2878 = vadd.xlane.f32.xlu0 %v2877_v27 }
0x1652   : > { %v2879_v29 = vpop.xlane.xlu0 %2878 }
0x1653   : > { %v2880_v30 = vmul.f32 0.03125, %v2879_v29 }
0x1655   : > { %v2881_v31 = vsub.f32 %v2872_v26, %v2880_v30 }
0x1657   : > { %v2882_v28 = vmul.f32 %v2881_v31, %v2881_v31 }
0x1659   : > { %v2883_v33 = vsel %vm670_vm0, %v2882_v28, 0.0 }
0x165a   : > { %2884 = vadd.xlane.f32.xlu0 %v2883_v33 }
0x16e7   : > { %v2885_v40 = vpop.xlane.xlu0 %2884 }
0x16e8   : > { %v2886_v41 = vmul.f32 0.03125, %v2885_v40 }
0x16ea   : > { %v2887_v42 = vadd.f32 1e-12, %v2886_v41 }
0x16ec   : > { %3612 = vrsqrt.f32 %v2887_v42 }
0x16f6   : > { %v3613_v43 = vpop.eup %3612 }
0x16f7   : > { %v2889_v45 = vmul.f32 %v3613_v43, %v2881_v31 }
0x16f9   : > { %v2896_v47 = vmul.f32 %v3160_v44, %v2889_v45 }
0x16fb   : > { %v2903_v32 = vadd.f32 %v3161_v46, %v2896_v47 }
0x16fd   : > { %3444 = vmatmul.mubr.msk.f32.vlgmr.msra.gmra.mrb[28].mxu1 %vm670_vm0, %v2903_v32 }
0x17d0   : > { %v2978_v4 = vpop.f32.mrb[28].mxu1 }
0x17d1   : > { %v2979_v48 = vadd.f32 %v2978_v4, %v2908_v12  ;;  %v3445_v49 = vpop.f32.mrb[29].mxu1 }
0x17d3   : > { %v2985_v50 = vsel %vm2984_vm6, %v2979_v48, 0.0 }
0x17d4   : > { %2986 = vadd.xlane.f32.xlu0 %v2985_v50 }
0x1861   : > { %v2987_v51 = vpop.xlane.xlu0 %2986 }
0x1862   : > { %v2988_v52 = vmul.f32 0.03125, %v2987_v51 }
0x1864   : > { %v2989_v53 = vsub.f32 %v2979_v48, %v2988_v52 }
0x1866   : > { %v2990_v54 = vmul.f32 %v2989_v53, %v2989_v53 }
0x1868   : > { %v2991_v55 = vsel %vm2984_vm6, %v2990_v54, 0.0 }
0x1869   : > { %2992 = vadd.xlane.f32.xlu1 %v2991_v55 }
0x18f6   : > { %v2993_v56 = vpop.xlane.xlu1 %2992 }
0x18f7   : > { %v2994_v57 = vmul.f32 0.03125, %v2993_v56 }
0x18f9   : > { %v2995_v59 = vadd.f32 1e-05, %v2994_v57 }
0x18fb   : > { %3614 = vrsqrt.f32 %v2995_v59 }
0x1905   : > { %v3615_v58 = vpop.eup %3614 }
0x1906   : > { %v2997_v61 = vmul.f32 %v3615_v58, %v2989_v53 }
0x1908   : > { %v2998_v15 = vmul.f32 %v2997_v61, %v2982_v60 }
0x190a   : > { %v2999_v63 = vadd.f32 %v2998_v15, %v2983_v62 }
0x190c   : > { %3000 = vst.msk [vmem:[%s657_s1] sm:$0x1] %vm2984_vm6, %v2999_v63 }
0x190d   : > { %3629 = shalt.err (!%p3626_p3)
}
0x190e   : > { %s3630_s6 = scalar_lea.hbm %s4303_s7, 16  ;;  %s3634_s1 = scalar_lea.hbm %s4367_s21, 32 }
0x190f   : > { %p3631_p4 = scmp.ne.s32.totalorder %s4303_s7, %s3630_s6  ;;  %p3635_p9 = scmp.lt.u32.totalorder %s4303_s7, %s4367_s21 }
0x1910   : > { %p3636_p10 = scmp.lt.u32.totalorder %s3634_s1, %s3630_s6  ;;  %p3638_p12 = scmp.lt.u32.totalorder %s3630_s6, %s4303_s7 }
0x1911   : > { %p3632_p7 = pnand %p3631_p4, %p3846_p5 }
0x1912   : > { %p3637_p11 = por %p3636_p10, %p3635_p9 }
0x1913   : > { %p3633_p8 = pneg %p3632_p7 }
0x1914   : > { %p3639_p13 = por %p3638_p12, %p3637_p11 }
0x1916   : > { %p3640_p0 = pnand %p3639_p13, %p3633_p8 }
0x1918   : > { %3643 = shalt.err (!%p3640_p0)
}
0x1919   : > { %3512 = dma.vmem_to_hbm [thread:$0]  (%p3846_p5), %s4305_s22, 16, %s4303_s7, %s3002_s26  }
0x191a PF: > { %p3518_p1 = scmp.ge.s32.totalorder %s3678_s27, 2  ;;  %s3026_s24 = sand.u32 1, %s3666_s2  }
0x191b   : > { %s3027_s30 = scalar_lea.sflag [#allocation3], %s3026_s24 }
0x191c   : > { %p3515_p2 = pnand %p3518_p1, %p3850_p6 }
0x191e   : > { %3661 = dma.done.wait (!%p3515_p2), %s3027_s30, 16  }
0x191f   : > { %3663 = vsyncadd (!%p3515_p2), %s3027_s30, 4294967280  ;;  %s4422_s27 = sld [smem:[#allocation6_spill]]  ;;  %s4423_s6 = sld [smem:[#allocation5_spill]] }
0x1920   : > { %s4424_s26 = sld [smem:[#allocation7_spill]]  ;;  %s4425_s2 = smov %s3670_s25 }
0x1925   : > { %p31_p3 = scmp.ge.s32.totalorder %s4422_s27, 4   ;;  %s4426_s25 = smov %s4423_s6 }
0x1927   :  { %33 = sbr.rel (!%p31_p3) target bundleno = 12 (0xc), region = 154 }
0x192e   :  { %3031 = vsyncpa [#allocation3], 1 }
0x192f   :  { %3033 = vsyncpa [#allocation3 + $0x1], 1 }

</bundles_post_ra>
